<compile_context>
chip_gen: v7x
topology: tpu7x:2x2x1
jax: 0.10.0
libtpu: 0.0.40
codegen_flags: <defaults>
</compile_context>

<pallas_src>
import jax
import jax.numpy as jnp
import numpy as np
from jax import lax
from jax.experimental import pallas as pl
from jax.experimental.pallas import tpu as pltpu

_EPS = 1e-5                      # PyTorch InstanceNorm2d default (affine=False)
_MATMUL_DTYPE = jnp.bfloat16     # MXU operand dtype (accumulation stays f32)


def _round_up(x, m):
    return (x + m - 1) // m * m


# ---------------------------------------------------------------------------
# Wrapper-side weight preparation (pure JAX/numpy, runs once)
# ---------------------------------------------------------------------------
def _tap_band_weights(w, wp, ci, w_out):
    """w: (3,3,Cin,Cout) HWIO.  wp/ci: per-lane ((column+1), in-channel) encoding
    of one activation row (wp == -1 marks dead zero lanes).  Returns A of shape
    (3, L, w_out*Cout) with
      A[dy, l, wo*Cout + co] = w[dy, wp[l]-wo, ci[l], co]   if 0 <= wp[l]-wo < 3
    so `dot(act_row_r, A[dy])` is the kernel-row-dy contribution computed from
    input row r (left/right zero padding handled by the validity mask)."""
    kh, kw, _, c_out = w.shape
    wo = np.arange(w_out)
    dx = wp[:, None] - wo[None, :]                       # (L, w_out)
    valid = (dx >= 0) & (dx < kw) & (wp[:, None] >= 0)
    dx_c = np.clip(dx, 0, kw - 1)
    t = w[:, dx_c, ci[:, None], :]                       # (3, L, w_out, Cout)
    t = t * jnp.asarray(valid, dtype=w.dtype)[None, :, :, None]
    return t.reshape(kh, len(wp), w_out * c_out)


def _shortcut_weight(wsc, wp, ci, w_out):
    """1x1 shortcut conv as a (L, w_out*Cout) matrix (reads only its own column)."""
    _, c_out = wsc.shape
    wo = np.arange(w_out)
    hit = (wp[:, None] == wo[None, :] + 1) & (wp[:, None] >= 0)
    s = wsc[ci][:, None, :] * jnp.asarray(hit, dtype=wsc.dtype)[:, :, None]
    return s.reshape(len(wp), w_out * c_out)


# ---------------------------------------------------------------------------
# Kernel
# ---------------------------------------------------------------------------
def _make_resblock_kernel(b_blk, h, w, c_out, lin, matmul_dtype):
    wc = w * c_out
    m = b_blk * h

    def kernel(x_ref, a1c_ref, a1e_ref, a2_ref, b1c_ref, b2_ref, t_ref, s_ref,
               out_ref):
        # x_ref:   (B_BLK, H, LIN)  bf16, lane = w*Cin + ci (no spatial padding)
        # a1c_ref: (LIN, 2*WC)      conv1 center-tap band ++ fused 1x1 shortcut
        # a1e_ref: (2, LIN, WC)     conv1 dy=0 / dy=2 band weights
        # a2_ref:  (3, WC, WC)      conv2 per-tap band weights
        # b1c_ref: (1, 2*WC) f32    [conv1 bias | shortcut bias], lane-tiled
        # b2_ref:  (1, WC)   f32
        # t_ref:   (M, M)    f32    per-image row sum + broadcast selector
        # s_ref:   (WC, WC)  f32    per-channel lane sum + broadcast selector (/HW)
        # out_ref: (B_BLK, H, WC)   bf16
        x = x_ref[...].reshape(m, lin)          # leading-dim merge (layout-free)

        row = lax.broadcasted_iota(jnp.int32, (m, wc), 0)
        not_top = (row % h) != 0                # row r-1 exists in the same image
        not_bot = (row % h) != (h - 1)          # row r+1 exists in the same image

        def shift_dn(v):                        # out[r] = v[r-1], 0 at image top rows
            return jnp.where(not_top, pltpu.roll(v, 1, axis=0), 0.0)

        def shift_up(v):                        # out[r] = v[r+1], 0 at image bottom rows
            return jnp.where(not_bot, pltpu.roll(v, m - 1, axis=0), 0.0)

        def inorm(v):                           # per-image/per-channel stats on the MXU
            mean = jnp.dot(
                jnp.dot(t_ref[...], v, preferred_element_type=jnp.float32),
                s_ref[...], preferred_element_type=jnp.float32)
            d = v - mean
            var = jnp.dot(
                jnp.dot(t_ref[...], d * d, preferred_element_type=jnp.float32),
                s_ref[...], preferred_element_type=jnp.float32)
            return d * lax.rsqrt(var + _EPS)

        # ---- conv1 + fused 1x1 shortcut: three K=LIN dots, shifts on f32 partials
        yc = jnp.dot(x, a1c_ref[...], preferred_element_type=jnp.float32) + b1c_ref[...]
        identity = yc[:, wc:]                   # shortcut (+ bias), stays in vregs
        y0 = jnp.dot(x, a1e_ref[0], preferred_element_type=jnp.float32)
        y2 = jnp.dot(x, a1e_ref[1], preferred_element_type=jnp.float32)
        conv1 = yc[:, :wc] + shift_dn(y0) + shift_up(y2)

        # ---- InstanceNorm1 + ReLU (f32), then one bf16 cast for conv2
        h1 = jnp.maximum(inorm(conv1), 0.0).astype(matmul_dtype)

        # ---- conv2: three K=WC dots, no VMEM halo buffer
        z0 = jnp.dot(h1, a2_ref[0], preferred_element_type=jnp.float32)
        z1 = jnp.dot(h1, a2_ref[1], preferred_element_type=jnp.float32)
        z2 = jnp.dot(h1, a2_ref[2], preferred_element_type=jnp.float32)
        conv2 = shift_dn(z0) + z1 + shift_up(z2) + b2_ref[...]

        # ---- InstanceNorm2 + residual add + ReLU; lane-dense store
        out = jnp.maximum(inorm(conv2) + identity, 0.0)
        out_ref[...] = out.reshape(b_blk, h, wc).astype(out_ref.dtype)

    return kernel


# ---------------------------------------------------------------------------
# Public wrapper
# ---------------------------------------------------------------------------
def residual_block_pallas(x_nchw, w1, b1, w2, b2, wsc, bsc,
                          matmul_dtype=_MATMUL_DTYPE, b_blk=None):
    """x_nchw: (N, Cin, H, W) f32.  Conv weights in HWIO.  Returns (N, Cout, H, W) f32."""
    n, c_in, h, w = x_nchw.shape
    c_out = w1.shape[-1]
    wc = w * c_out
    lin = _round_up(w * c_in, 128)                 # lanes per input row
    if b_blk is None:
        # Fill the MXU M dimension.  At scale, pick b_blk so the grid keeps
        # >= 2 steps per TensorCore (v7x has two) for DMA/compute overlap.
        b_blk = min(n, 8)
    n_blocks = pl.cdiv(n, b_blk)
    n_pad = n_blocks * b_blk
    m = b_blk * h

    # ---- activations: NCHW -> lane-dense rows (lane = w*Cin + ci), bf16 ----
    x_rows = jnp.transpose(x_nchw, (0, 2, 3, 1)).reshape(n, h, w * c_in)
    x_rows = jnp.pad(x_rows, ((0, n_pad - n), (0, 0), (0, lin - w * c_in)))
    x_rows = x_rows.astype(matmul_dtype)

    # ---- per-lane (column+1, channel) encodings ----
    l1 = np.arange(lin)
    wp1 = np.where(l1 < w * c_in, l1 // c_in + 1, -1)
    ci1 = np.where(l1 < w * c_in, l1 % c_in, 0)
    l2 = np.arange(wc)
    wp2 = l2 // c_out + 1
    ci2 = l2 % c_out

    # ---- band / Toeplitz weights (one-time) ----
    a1 = _tap_band_weights(w1, wp1, ci1, w)                            # (3, LIN, WC)
    asc = _shortcut_weight(wsc.reshape(c_in, c_out), wp1, ci1, w)      # (LIN, WC)
    a1c = jnp.concatenate([a1[1], asc], axis=1).astype(matmul_dtype)   # (LIN, 2WC)
    a1e = jnp.stack([a1[0], a1[2]]).astype(matmul_dtype)               # (2, LIN, WC)
    a2 = _tap_band_weights(w2, wp2, ci2, w).astype(matmul_dtype)       # (3, WC, WC)
    b1c = jnp.concatenate([jnp.tile(b1, w), jnp.tile(bsc, w)]).reshape(1, 2 * wc)
    b2r = jnp.tile(b2, w).reshape(1, wc)

    # ---- InstanceNorm selector constants (sum + broadcast on the MXU) ----
    t_sel = jnp.asarray(
        (np.arange(m)[:, None] // h) == (np.arange(m)[None, :] // h), jnp.float32)
    s_sel = jnp.asarray(
        (np.arange(wc)[:, None] % c_out) == (np.arange(wc)[None, :] % c_out),
        jnp.float32) / float(h * w)

    kernel = _make_resblock_kernel(b_blk, h, w, c_out, lin, matmul_dtype)
    out_rows = pl.pallas_call(
        kernel,
        out_shape=jax.ShapeDtypeStruct((n_pad, h, wc), matmul_dtype),
        grid_spec=pltpu.PrefetchScalarGridSpec(
            num_scalar_prefetch=0,
            grid=(n_blocks,),
            in_specs=[
                pl.BlockSpec((b_blk, h, lin), lambda i: (i, 0, 0)),
                pl.BlockSpec((lin, 2 * wc), lambda i: (0, 0)),
                pl.BlockSpec((2, lin, wc), lambda i: (0, 0, 0)),
                pl.BlockSpec((3, wc, wc), lambda i: (0, 0, 0)),
                pl.BlockSpec((1, 2 * wc), lambda i: (0, 0)),
                pl.BlockSpec((1, wc), lambda i: (0, 0)),
                pl.BlockSpec((m, m), lambda i: (0, 0)),
                pl.BlockSpec((wc, wc), lambda i: (0, 0)),
            ],
            out_specs=pl.BlockSpec((b_blk, h, wc), lambda i: (i, 0, 0)),
        ),
        compiler_params=pltpu.CompilerParams(dimension_semantics=("parallel",)),
    )(x_rows, a1c, a1e, a2,
      b1c.astype(jnp.float32), b2r.astype(jnp.float32), t_sel, s_sel)

    out = out_rows[:n].astype(jnp.float32).reshape(n, h, w, c_out)
    return jnp.transpose(out, (0, 3, 1, 2))


def residual_block_ref(x_nchw, w1, b1, w2, b2, wsc, bsc):
    """Pure-JAX f32 reference matching the PyTorch module semantics."""
    def conv(x, wgt, b, pad):
        y = lax.conv_general_dilated(
            x, wgt, window_strides=(1, 1), padding=[(pad, pad), (pad, pad)],
            dimension_numbers=("NCHW", "HWIO", "NCHW"))
        return y + b[None, :, None, None]

    def inorm(x):
        mu = jnp.mean(x, axis=(2, 3), keepdims=True)
        var = jnp.mean((x - mu) ** 2, axis=(2, 3), keepdims=True)
        return (x - mu) * lax.rsqrt(var + _EPS)

    identity = conv(x_nchw, wsc, bsc, 0)
    out = jnp.maximum(inorm(conv(x_nchw, w1, b1, 1)), 0.0)
    out = inorm(conv(out, w2, b2, 1))
    return jnp.maximum(out + identity, 0.0)


if __name__ == "__main__":
    N, Cin, Cout, H, W = 2, 4, 8, 16, 16

    key = jax.random.PRNGKey(0)
    ks = jax.random.split(key, 7)
    x = jax.random.normal(ks[0], (N, Cin, H, W), jnp.float32)

    # Deterministic synthetic parameters (shapes match nn.Conv2d of the module).
    w1 = 0.1 * jax.random.normal(ks[1], (3, 3, Cin, Cout), jnp.float32)   # conv1 (HWIO)
    b1 = 0.1 * jax.random.normal(ks[2], (Cout,), jnp.float32)
    w2 = 0.1 * jax.random.normal(ks[3], (3, 3, Cout, Cout), jnp.float32)  # conv2 (HWIO)
    b2 = 0.1 * jax.random.normal(ks[4], (Cout,), jnp.float32)
    wsc = 0.1 * jax.random.normal(ks[5], (1, 1, Cin, Cout), jnp.float32)  # shortcut (HWIO)
    bsc = 0.1 * jax.random.normal(ks[6], (Cout,), jnp.float32)

    out = jax.block_until_ready(residual_block_pallas(x, w1, b1, w2, b2, wsc, bsc))
    ref = residual_block_ref(x, w1, b1, w2, b2, wsc, bsc)

    assert out.shape == (N, Cout, H, W)
    # bf16 MXU operands / bf16 output store (f32 accumulation + f32 InstanceNorm)
    # => bf16-level tolerance.
    tol = 1e-4 if _MATMUL_DTYPE == jnp.float32 else 5e-2
    assert jnp.allclose(out, ref, atol=tol, rtol=tol), "mismatch vs JAX reference"
    print("KERNEL_OK")
</pallas_src>

<mosaic_0001>
module attributes {stable_mosaic.version = 11 : i64} {
  func.func @kernel(%arg0: i32, %arg1: memref<2x16x128xbf16, #tpu.memory_space<vmem>>, %arg2: memref<128x256xbf16, #tpu.memory_space<vmem>>, %arg3: memref<2x128x128xbf16, #tpu.memory_space<vmem>>, %arg4: memref<3x128x128xbf16, #tpu.memory_space<vmem>>, %arg5: memref<1x256xf32, #tpu.memory_space<vmem>>, %arg6: memref<1x128xf32, #tpu.memory_space<vmem>>, %arg7: memref<32x32xf32, #tpu.memory_space<vmem>>, %arg8: memref<128x128xf32, #tpu.memory_space<vmem>>, %arg9: memref<2x16x128xbf16, #tpu.memory_space<vmem>>) attributes {dimension_semantics = [#tpu.dimension_semantics<parallel>], iteration_bounds = array<i64: 1>, scalar_prefetch = 0 : i64, scratch_operands = 0 : i64, tpu.core_type = #tpu.core_type<tc>, window_params = [{transform_indices = @transform_0, window_bounds = array<i64: 2, 16, 128>}, {pipeline_mode = #tpu.pipeline_mode<synchronous>, transform_indices = @transform_1, window_bounds = array<i64: 128, 256>}, {pipeline_mode = #tpu.pipeline_mode<synchronous>, transform_indices = @transform_2, window_bounds = array<i64: 2, 128, 128>}, {pipeline_mode = #tpu.pipeline_mode<synchronous>, transform_indices = @transform_3, window_bounds = array<i64: 3, 128, 128>}, {pipeline_mode = #tpu.pipeline_mode<synchronous>, transform_indices = @transform_4, window_bounds = array<i64: 1, 256>}, {pipeline_mode = #tpu.pipeline_mode<synchronous>, transform_indices = @transform_5, window_bounds = array<i64: 1, 128>}, {pipeline_mode = #tpu.pipeline_mode<synchronous>, transform_indices = @transform_6, window_bounds = array<i64: 32, 32>}, {pipeline_mode = #tpu.pipeline_mode<synchronous>, transform_indices = @transform_7, window_bounds = array<i64: 128, 128>}, {transform_indices = @transform_8, window_bounds = array<i64: 2, 16, 128>}]} {
    %c0 = arith.constant 0 : index
    %c0_0 = arith.constant 0 : index
    %c0_1 = arith.constant 0 : index
    %0 = vector.load %arg1[%c0, %c0_0, %c0_1] : memref<2x16x128xbf16, #tpu.memory_space<vmem>>, vector<2x16x128xbf16>
    %1 = vector.shape_cast %0 : vector<2x16x128xbf16> to vector<32x128xbf16>
    %2 = tpu.iota {dimensions = array<i32: 0>} : vector<32x128xi32>
    %c16_i32 = arith.constant 16 : i32
    %c0_i32 = arith.constant 0 : i32
    %3 = arith.cmpi eq, %c16_i32, %c0_i32 : i32
    %c1_i32 = arith.constant 1 : i32
    %4 = arith.select %3, %c1_i32, %c16_i32 : i32
    %5 = vector.broadcast %4 : i32 to vector<32x128xi32>
    %6 = arith.remsi %2, %5 : vector<32x128xi32>
    %c0_i32_2 = arith.constant 0 : i32
    %7 = vector.broadcast %c0_i32_2 : i32 to vector<32x128xi32>
    %8 = arith.cmpi ne, %6, %7 : vector<32x128xi32>
    %c0_i32_3 = arith.constant 0 : i32
    %9 = vector.broadcast %c0_i32_3 : i32 to vector<32x128xi32>
    %10 = arith.cmpi slt, %6, %9 : vector<32x128xi32>
    %c0_i32_4 = arith.constant 0 : i32
    %11 = arith.cmpi slt, %4, %c0_i32_4 : i32
    %12 = vector.broadcast %11 : i1 to vector<32x128xi1>
    %13 = vector.broadcast %12 : vector<32x128xi1> to vector<32x128xi1>
    %14 = arith.xori %10, %13 : vector<32x128xi1>
    %15 = arith.andi %14, %8 : vector<32x128xi1>
    %16 = vector.broadcast %4 : i32 to vector<32x128xi32>
    %17 = arith.addi %6, %16 : vector<32x128xi32>
    %18 = arith.select %15, %17, %6 : vector<32x128xi1>, vector<32x128xi32>
    %c0_i32_5 = arith.constant 0 : i32
    %19 = vector.broadcast %c0_i32_5 : i32 to vector<32x128xi32>
    %20 = arith.cmpi ne, %18, %19 : vector<32x128xi32>
    %c16_i32_6 = arith.constant 16 : i32
    %c0_i32_7 = arith.constant 0 : i32
    %21 = arith.cmpi eq, %c16_i32_6, %c0_i32_7 : i32
    %c1_i32_8 = arith.constant 1 : i32
    %22 = arith.select %21, %c1_i32_8, %c16_i32_6 : i32
    %23 = vector.broadcast %22 : i32 to vector<32x128xi32>
    %24 = arith.remsi %2, %23 : vector<32x128xi32>
    %c0_i32_9 = arith.constant 0 : i32
    %25 = vector.broadcast %c0_i32_9 : i32 to vector<32x128xi32>
    %26 = arith.cmpi ne, %24, %25 : vector<32x128xi32>
    %c0_i32_10 = arith.constant 0 : i32
    %27 = vector.broadcast %c0_i32_10 : i32 to vector<32x128xi32>
    %28 = arith.cmpi slt, %24, %27 : vector<32x128xi32>
    %c0_i32_11 = arith.constant 0 : i32
    %29 = arith.cmpi slt, %22, %c0_i32_11 : i32
    %30 = vector.broadcast %29 : i1 to vector<32x128xi1>
    %31 = vector.broadcast %30 : vector<32x128xi1> to vector<32x128xi1>
    %32 = arith.xori %28, %31 : vector<32x128xi1>
    %33 = arith.andi %32, %26 : vector<32x128xi1>
    %34 = vector.broadcast %22 : i32 to vector<32x128xi32>
    %35 = arith.addi %24, %34 : vector<32x128xi32>
    %36 = arith.select %33, %35, %24 : vector<32x128xi1>, vector<32x128xi32>
    %c15_i32 = arith.constant 15 : i32
    %37 = vector.broadcast %c15_i32 : i32 to vector<32x128xi32>
    %38 = arith.cmpi ne, %36, %37 : vector<32x128xi32>
    %c0_12 = arith.constant 0 : index
    %c0_13 = arith.constant 0 : index
    %39 = vector.load %arg2[%c0_12, %c0_13] : memref<128x256xbf16, #tpu.memory_space<vmem>>, vector<128x256xbf16>
    %cst = arith.constant dense<0.000000e+00> : vector<32x256xf32>
    %40 = tpu.matmul %1, %39, %cst {dimension_numbers = #tpu.dot_dimension_numbers<[1], [0], [0], [1], [0, 0, 1, 1], [], []>} : vector<32x128xbf16>, vector<128x256xbf16>, vector<32x256xf32> -> vector<32x256xf32>
    %c0_14 = arith.constant 0 : index
    %c0_15 = arith.constant 0 : index
    %41 = vector.load %arg5[%c0_14, %c0_15] : memref<1x256xf32, #tpu.memory_space<vmem>>, vector<1x256xf32>
    %42 = vector.broadcast %41 : vector<1x256xf32> to vector<32x256xf32>
    %43 = arith.addf %40, %42 : vector<32x256xf32>
    %44 = vector.extract_strided_slice %43 {offsets = [0, 128], sizes = [32, 128], strides = [1, 1]} : vector<32x256xf32> to vector<32x128xf32>
    %c0_16 = arith.constant 0 : index
    %c0_17 = arith.constant 0 : index
    %c0_18 = arith.constant 0 : index
    %45 = vector.load %arg3[%c0_16, %c0_17, %c0_18] : memref<2x128x128xbf16, #tpu.memory_space<vmem>>, vector<1x128x128xbf16>
    %46 = vector.shape_cast %45 : vector<1x128x128xbf16> to vector<128x128xbf16>
    %cst_19 = arith.constant dense<0.000000e+00> : vector<32x128xf32>
    %47 = tpu.matmul %1, %46, %cst_19 {dimension_numbers = #tpu.dot_dimension_numbers<[1], [0], [0], [1], [0, 0, 1, 1], [], []>} : vector<32x128xbf16>, vector<128x128xbf16>, vector<32x128xf32> -> vector<32x128xf32>
    %c1 = arith.constant 1 : index
    %c0_20 = arith.constant 0 : index
    %c0_21 = arith.constant 0 : index
    %48 = vector.load %arg3[%c1, %c0_20, %c0_21] : memref<2x128x128xbf16, #tpu.memory_space<vmem>>, vector<1x128x128xbf16>
    %49 = vector.shape_cast %48 : vector<1x128x128xbf16> to vector<128x128xbf16>
    %cst_22 = arith.constant dense<0.000000e+00> : vector<32x128xf32>
    %50 = tpu.matmul %1, %49, %cst_22 {dimension_numbers = #tpu.dot_dimension_numbers<[1], [0], [0], [1], [0, 0, 1, 1], [], []>} : vector<32x128xbf16>, vector<128x128xbf16>, vector<32x128xf32> -> vector<32x128xf32>
    %51 = vector.extract_strided_slice %43 {offsets = [0, 0], sizes = [32, 128], strides = [1, 1]} : vector<32x256xf32> to vector<32x128xf32>
    %c1_i32_23 = arith.constant 1 : i32
    %52 = tpu.dynamic_rotate %47 by %c1_i32_23 dim 0 : vector<32x128xf32>, i32 -> vector<32x128xf32>
    %cst_24 = arith.constant 0.000000e+00 : f32
    %53 = vector.broadcast %cst_24 : f32 to vector<32x128xf32>
    %54 = arith.select %20, %52, %53 : vector<32x128xi1>, vector<32x128xf32>
    %55 = arith.addf %51, %54 : vector<32x128xf32>
    %c31_i32 = arith.constant 31 : i32
    %56 = tpu.dynamic_rotate %50 by %c31_i32 dim 0 : vector<32x128xf32>, i32 -> vector<32x128xf32>
    %cst_25 = arith.constant 0.000000e+00 : f32
    %57 = vector.broadcast %cst_25 : f32 to vector<32x128xf32>
    %58 = arith.select %38, %56, %57 : vector<32x128xi1>, vector<32x128xf32>
    %59 = arith.addf %55, %58 : vector<32x128xf32>
    %c0_26 = arith.constant 0 : index
    %c0_27 = arith.constant 0 : index
    %60 = vector.load %arg7[%c0_26, %c0_27] : memref<32x32xf32, #tpu.memory_space<vmem>>, vector<32x32xf32>
    %cst_28 = arith.constant dense<0.000000e+00> : vector<32x128xf32>
    %61 = tpu.matmul %60, %59, %cst_28 {dimension_numbers = #tpu.dot_dimension_numbers<[1], [0], [0], [1], [0, 0, 1, 1], [], []>} : vector<32x32xf32>, vector<32x128xf32>, vector<32x128xf32> -> vector<32x128xf32>
    %c0_29 = arith.constant 0 : index
    %c0_30 = arith.constant 0 : index
    %62 = vector.load %arg8[%c0_29, %c0_30] : memref<128x128xf32, #tpu.memory_space<vmem>>, vector<128x128xf32>
    %cst_31 = arith.constant dense<0.000000e+00> : vector<32x128xf32>
    %63 = tpu.matmul %61, %62, %cst_31 {dimension_numbers = #tpu.dot_dimension_numbers<[1], [0], [0], [1], [0, 0, 1, 1], [], []>} : vector<32x128xf32>, vector<128x128xf32>, vector<32x128xf32> -> vector<32x128xf32>
    %64 = arith.subf %59, %63 : vector<32x128xf32>
    %c0_32 = arith.constant 0 : index
    %c0_33 = arith.constant 0 : index
    %65 = vector.load %arg7[%c0_32, %c0_33] : memref<32x32xf32, #tpu.memory_space<vmem>>, vector<32x32xf32>
    %66 = arith.mulf %64, %64 : vector<32x128xf32>
    %cst_34 = arith.constant dense<0.000000e+00> : vector<32x128xf32>
    %67 = tpu.matmul %65, %66, %cst_34 {dimension_numbers = #tpu.dot_dimension_numbers<[1], [0], [0], [1], [0, 0, 1, 1], [], []>} : vector<32x32xf32>, vector<32x128xf32>, vector<32x128xf32> -> vector<32x128xf32>
    %c0_35 = arith.constant 0 : index
    %c0_36 = arith.constant 0 : index
    %68 = vector.load %arg8[%c0_35, %c0_36] : memref<128x128xf32, #tpu.memory_space<vmem>>, vector<128x128xf32>
    %cst_37 = arith.constant dense<0.000000e+00> : vector<32x128xf32>
    %69 = tpu.matmul %67, %68, %cst_37 {dimension_numbers = #tpu.dot_dimension_numbers<[1], [0], [0], [1], [0, 0, 1, 1], [], []>} : vector<32x128xf32>, vector<128x128xf32>, vector<32x128xf32> -> vector<32x128xf32>
    %cst_38 = arith.constant 9.99999974E-6 : f32
    %70 = vector.broadcast %cst_38 : f32 to vector<32x128xf32>
    %71 = arith.addf %69, %70 : vector<32x128xf32>
    %72 = math.rsqrt %71 : vector<32x128xf32>
    %73 = arith.mulf %64, %72 : vector<32x128xf32>
    %cst_39 = arith.constant 0.000000e+00 : f32
    %74 = vector.broadcast %cst_39 : f32 to vector<32x128xf32>
    %75 = arith.maximumf %73, %74 : vector<32x128xf32>
    %76 = arith.truncf %75 : vector<32x128xf32> to vector<32x128xbf16>
    %c0_40 = arith.constant 0 : index
    %c0_41 = arith.constant 0 : index
    %c0_42 = arith.constant 0 : index
    %77 = vector.load %arg4[%c0_40, %c0_41, %c0_42] : memref<3x128x128xbf16, #tpu.memory_space<vmem>>, vector<1x128x128xbf16>
    %78 = vector.shape_cast %77 : vector<1x128x128xbf16> to vector<128x128xbf16>
    %cst_43 = arith.constant dense<0.000000e+00> : vector<32x128xf32>
    %79 = tpu.matmul %76, %78, %cst_43 {dimension_numbers = #tpu.dot_dimension_numbers<[1], [0], [0], [1], [0, 0, 1, 1], [], []>} : vector<32x128xbf16>, vector<128x128xbf16>, vector<32x128xf32> -> vector<32x128xf32>
    %c1_44 = arith.constant 1 : index
    %c0_45 = arith.constant 0 : index
    %c0_46 = arith.constant 0 : index
    %80 = vector.load %arg4[%c1_44, %c0_45, %c0_46] : memref<3x128x128xbf16, #tpu.memory_space<vmem>>, vector<1x128x128xbf16>
    %81 = vector.shape_cast %80 : vector<1x128x128xbf16> to vector<128x128xbf16>
    %cst_47 = arith.constant dense<0.000000e+00> : vector<32x128xf32>
    %82 = tpu.matmul %76, %81, %cst_47 {dimension_numbers = #tpu.dot_dimension_numbers<[1], [0], [0], [1], [0, 0, 1, 1], [], []>} : vector<32x128xbf16>, vector<128x128xbf16>, vector<32x128xf32> -> vector<32x128xf32>
    %c2 = arith.constant 2 : index
    %c0_48 = arith.constant 0 : index
    %c0_49 = arith.constant 0 : index
    %83 = vector.load %arg4[%c2, %c0_48, %c0_49] : memref<3x128x128xbf16, #tpu.memory_space<vmem>>, vector<1x128x128xbf16>
    %84 = vector.shape_cast %83 : vector<1x128x128xbf16> to vector<128x128xbf16>
    %cst_50 = arith.constant dense<0.000000e+00> : vector<32x128xf32>
    %85 = tpu.matmul %76, %84, %cst_50 {dimension_numbers = #tpu.dot_dimension_numbers<[1], [0], [0], [1], [0, 0, 1, 1], [], []>} : vector<32x128xbf16>, vector<128x128xbf16>, vector<32x128xf32> -> vector<32x128xf32>
    %c1_i32_51 = arith.constant 1 : i32
    %86 = tpu.dynamic_rotate %79 by %c1_i32_51 dim 0 : vector<32x128xf32>, i32 -> vector<32x128xf32>
    %cst_52 = arith.constant 0.000000e+00 : f32
    %87 = vector.broadcast %cst_52 : f32 to vector<32x128xf32>
    %88 = arith.select %20, %86, %87 : vector<32x128xi1>, vector<32x128xf32>
    %89 = arith.addf %88, %82 : vector<32x128xf32>
    %c31_i32_53 = arith.constant 31 : i32
    %90 = tpu.dynamic_rotate %85 by %c31_i32_53 dim 0 : vector<32x128xf32>, i32 -> vector<32x128xf32>
    %cst_54 = arith.constant 0.000000e+00 : f32
    %91 = vector.broadcast %cst_54 : f32 to vector<32x128xf32>
    %92 = arith.select %38, %90, %91 : vector<32x128xi1>, vector<32x128xf32>
    %93 = arith.addf %89, %92 : vector<32x128xf32>
    %c0_55 = arith.constant 0 : index
    %c0_56 = arith.constant 0 : index
    %94 = vector.load %arg6[%c0_55, %c0_56] : memref<1x128xf32, #tpu.memory_space<vmem>>, vector<1x128xf32>
    %95 = vector.broadcast %94 : vector<1x128xf32> to vector<32x128xf32>
    %96 = arith.addf %93, %95 : vector<32x128xf32>
    %c0_57 = arith.constant 0 : index
    %c0_58 = arith.constant 0 : index
    %97 = vector.load %arg7[%c0_57, %c0_58] : memref<32x32xf32, #tpu.memory_space<vmem>>, vector<32x32xf32>
    %cst_59 = arith.constant dense<0.000000e+00> : vector<32x128xf32>
    %98 = tpu.matmul %97, %96, %cst_59 {dimension_numbers = #tpu.dot_dimension_numbers<[1], [0], [0], [1], [0, 0, 1, 1], [], []>} : vector<32x32xf32>, vector<32x128xf32>, vector<32x128xf32> -> vector<32x128xf32>
    %c0_60 = arith.constant 0 : index
    %c0_61 = arith.constant 0 : index
    %99 = vector.load %arg8[%c0_60, %c0_61] : memref<128x128xf32, #tpu.memory_space<vmem>>, vector<128x128xf32>
    %cst_62 = arith.constant dense<0.000000e+00> : vector<32x128xf32>
    %100 = tpu.matmul %98, %99, %cst_62 {dimension_numbers = #tpu.dot_dimension_numbers<[1], [0], [0], [1], [0, 0, 1, 1], [], []>} : vector<32x128xf32>, vector<128x128xf32>, vector<32x128xf32> -> vector<32x128xf32>
    %101 = arith.subf %96, %100 : vector<32x128xf32>
    %c0_63 = arith.constant 0 : index
    %c0_64 = arith.constant 0 : index
    %102 = vector.load %arg7[%c0_63, %c0_64] : memref<32x32xf32, #tpu.memory_space<vmem>>, vector<32x32xf32>
    %103 = arith.mulf %101, %101 : vector<32x128xf32>
    %cst_65 = arith.constant dense<0.000000e+00> : vector<32x128xf32>
    %104 = tpu.matmul %102, %103, %cst_65 {dimension_numbers = #tpu.dot_dimension_numbers<[1], [0], [0], [1], [0, 0, 1, 1], [], []>} : vector<32x32xf32>, vector<32x128xf32>, vector<32x128xf32> -> vector<32x128xf32>
    %c0_66 = arith.constant 0 : index
    %c0_67 = arith.constant 0 : index
    %105 = vector.load %arg8[%c0_66, %c0_67] : memref<128x128xf32, #tpu.memory_space<vmem>>, vector<128x128xf32>
    %cst_68 = arith.constant dense<0.000000e+00> : vector<32x128xf32>
    %106 = tpu.matmul %104, %105, %cst_68 {dimension_numbers = #tpu.dot_dimension_numbers<[1], [0], [0], [1], [0, 0, 1, 1], [], []>} : vector<32x128xf32>, vector<128x128xf32>, vector<32x128xf32> -> vector<32x128xf32>
    %cst_69 = arith.constant 9.99999974E-6 : f32
    %107 = vector.broadcast %cst_69 : f32 to vector<32x128xf32>
    %108 = arith.addf %106, %107 : vector<32x128xf32>
    %109 = math.rsqrt %108 : vector<32x128xf32>
    %110 = arith.mulf %101, %109 : vector<32x128xf32>
    %111 = arith.addf %110, %44 : vector<32x128xf32>
    %cst_70 = arith.constant 0.000000e+00 : f32
    %112 = vector.broadcast %cst_70 : f32 to vector<32x128xf32>
    %113 = arith.maximumf %111, %112 : vector<32x128xf32>
    %114 = vector.shape_cast %113 : vector<32x128xf32> to vector<2x16x128xf32>
    %115 = arith.truncf %114 : vector<2x16x128xf32> to vector<2x16x128xbf16>
    %c0_71 = arith.constant 0 : index
    %c0_72 = arith.constant 0 : index
    %c0_73 = arith.constant 0 : index
    %116 = vector.load %arg9[%c0_71, %c0_72, %c0_73] : memref<2x16x128xbf16, #tpu.memory_space<vmem>>, vector<2x16x128xbf16>
    tpu.vector_store %arg9[%c0_71, %c0_72, %c0_73], %115 {strides = array<i32>} : memref<2x16x128xbf16, #tpu.memory_space<vmem>>, vector<2x16x128xbf16>,
    return
  }
  func.func @transform_0(%arg0: i32) -> (i32, i32, i32) {
    %c0_i32 = arith.constant 0 : i32
    %c0_i32_0 = arith.constant 0 : i32
    %c0_i32_1 = arith.constant 0 : i32
    return %arg0, %c0_i32, %c0_i32_0 : i32, i32, i32
  }
  func.func @transform_1(%arg0: i32) -> (i32, i32) {
    %c0_i32 = arith.constant 0 : i32
    %c0_i32_0 = arith.constant 0 : i32
    %c0_i32_1 = arith.constant 0 : i32
    return %c0_i32, %c0_i32_0 : i32, i32
  }
  func.func @transform_2(%arg0: i32) -> (i32, i32, i32) {
    %c0_i32 = arith.constant 0 : i32
    %c0_i32_0 = arith.constant 0 : i32
    %c0_i32_1 = arith.constant 0 : i32
    %c0_i32_2 = arith.constant 0 : i32
    return %c0_i32, %c0_i32_0, %c0_i32_1 : i32, i32, i32
  }
  func.func @transform_3(%arg0: i32) -> (i32, i32, i32) {
    %c0_i32 = arith.constant 0 : i32
    %c0_i32_0 = arith.constant 0 : i32
    %c0_i32_1 = arith.constant 0 : i32
    %c0_i32_2 = arith.constant 0 : i32
    return %c0_i32, %c0_i32_0, %c0_i32_1 : i32, i32, i32
  }
  func.func @transform_4(%arg0: i32) -> (i32, i32) {
    %c0_i32 = arith.constant 0 : i32
    %c0_i32_0 = arith.constant 0 : i32
    %c0_i32_1 = arith.constant 0 : i32
    return %c0_i32, %c0_i32_0 : i32, i32
  }
  func.func @transform_5(%arg0: i32) -> (i32, i32) {
    %c0_i32 = arith.constant 0 : i32
    %c0_i32_0 = arith.constant 0 : i32
    %c0_i32_1 = arith.constant 0 : i32
    return %c0_i32, %c0_i32_0 : i32, i32
  }
  func.func @transform_6(%arg0: i32) -> (i32, i32) {
    %c0_i32 = arith.constant 0 : i32
    %c0_i32_0 = arith.constant 0 : i32
    %c0_i32_1 = arith.constant 0 : i32
    return %c0_i32, %c0_i32_0 : i32, i32
  }
  func.func @transform_7(%arg0: i32) -> (i32, i32) {
    %c0_i32 = arith.constant 0 : i32
    %c0_i32_0 = arith.constant 0 : i32
    %c0_i32_1 = arith.constant 0 : i32
    return %c0_i32, %c0_i32_0 : i32, i32
  }
  func.func @transform_8(%arg0: i32) -> (i32, i32, i32) {
    %c0_i32 = arith.constant 0 : i32
    %c0_i32_0 = arith.constant 0 : i32
    %c0_i32_1 = arith.constant 0 : i32
    return %arg0, %c0_i32, %c0_i32_0 : i32, i32, i32
  }
}

</mosaic_0001>

<bundles_post_ra>
// kernel: tpu_custom_call.1
= control target key start
LH: loop header
LB: loop body
LE: loop exit
PB: predicated region body
PF: predicated region fallthrough
CT: control target
= control target key end

     0   :  { %13 = vsyncpa [#allocation3], 0  ;;  %s3187_s0 = inlined_call_operand.hbm [shape: bf16[2,16,128], index: 0, kind: input, shape index: {}]   ;;  %s3188_s1 = inlined_call_operand.hbm [shape: bf16[128,256], index: 1, kind: input, shape index: {}]   ;;  %s3189_s2 = inlined_call_operand.hbm [shape: bf16[2,128,128], index: 2, kind: input, shape index: {}]   ;;  %s3190_s3 = inlined_call_operand.hbm [shape: bf16[3,128,128], index: 3, kind: input, shape index: {}]   ;;  %s3191_s4 = inlined_call_operand.vmem [shape: f32[1,256], index: 4, kind: input, shape index: {}]   ;;  %s3192_s5 = inlined_call_operand.vmem [shape: f32[1,128], index: 5, kind: input, shape index: {}]   ;;  %s3193_s6 = inlined_call_operand.hbm [shape: f32[32,32], index: 6, kind: input, shape index: {}]   ;;  %s3194_s7 = inlined_call_operand.hbm [shape: f32[128,128], index: 7, kind: input, shape index: {}]   ;;  %s3195_s8 = inlined_call_operand.hbm [shape: bf16[2,16,128], index: 8, kind: output, shape index: {}]  }
   0x1   :  { %14 = vsyncpa [#allocation6], 0 }
   0x2   :  { %15 = vsyncpa [#allocation9], 0 }
   0x3   :  { %16 = vsyncpa [#allocation12], 0 }
   0x4   :  { %17 = vsyncpa [#allocation4], 0  ;;  %s2777_s27 = smov [#allocation5]   ;;  %s2613_s9 = scalar_lea.hbm %s3188_s1, 2048 }
   0x5   :  { %s35_s28 = sshll.u32 %s2777_s27, 4  ;;  %p2614_p0 = scmp.ne.s32.totalorder %s3188_s1, %s2613_s9  ;;  %s36_s28 = int_to_ptr.vmem [resolvable:$true] %s35_s28 }
   0x6   :  { %p2617_p1 = scmp.lt.u32.totalorder %s2613_s9, %s3188_s1 }
   0x8   :  { %p2619_p2 = pnand %p2617_p1, %p2614_p0 }
   0xa   :  { %2622 = shalt.err (!%p2619_p2)
}
   0xb   :  { %s2623_s14 = scalar_lea.vmem %s36_s28, 2048  ;;  %p2628_p4 = scmp.lt.s32.totalorder %s36_s28, %s36_s28 }
   0xc   :  { %p2624_p3 = scmp.ne.s32.totalorder %s36_s28, %s2623_s14  ;;  %p2629_p5 = scmp.lt.s32.totalorder %s2623_s14, %s2623_s14 }
   0xe   :  { %p2630_p6 = por %p2629_p5, %p2628_p4 }
  0x10   :  { %p2631_p7 = pnand %p2630_p6, %p2624_p3 }
  0x12   :  { %2634 = shalt.err (!%p2631_p7)
}
  0x13   :  { %s2778_s15 = smov 128   ;;  %s2779_s16 = smov 8  }
  0x14   :  { %41 = dma.hbm_to_vmem [thread:$0]  %s3188_s1, 2048, %s36_s28, [#allocation6], %s2778_s15, %s2778_s15, %s2779_s16  }
  0x15   :  { %s2780_s19 = smov [#allocation8]   ;;  %s2781_s21 = smov [#allocation2]  }
  0x16   :  { %s59_s20 = sshll.u32 %s2780_s19, 4  ;;  %s23_s22 = sshll.u32 %s2781_s21, 4  ;;  %s60_s20 = int_to_ptr.vmem [resolvable:$true] %s59_s20  ;;  %s24_s22 = int_to_ptr.vmem [resolvable:$true] %s23_s22 }
  0x17   :  { %s2635_s25 = scalar_lea.hbm %s3190_s3, 3072 }
  0x18   :  { %p2636_p8 = scmp.ne.s32.totalorder %s3190_s3, %s2635_s25  ;;  %p2639_p9 = scmp.lt.u32.totalorder %s2635_s25, %s3190_s3 }
  0x1a   :  { %p2641_p10 = pnand %p2639_p9, %p2636_p8 }
  0x1c   :  { %2644 = shalt.err (!%p2641_p10)
}
  0x1d   :  { %s2645_s1 = scalar_lea.vmem %s60_s20, 3072  ;;  %p2650_p12 = scmp.lt.s32.totalorder %s60_s20, %s60_s20 }
  0x1e   :  { %p2646_p11 = scmp.ne.s32.totalorder %s60_s20, %s2645_s1  ;;  %p2651_p13 = scmp.lt.s32.totalorder %s2645_s1, %s2645_s1 }
  0x20   :  { %p2652_p0 = por %p2651_p13, %p2650_p12 }
  0x22   :  { %p2653_p1 = pnand %p2652_p0, %p2646_p11 }
  0x24   :  { %2656 = shalt.err (!%p2653_p1)
}
  0x25   :  { %s2782_s28 = smov 64   ;;  %s2783_s9 = smov 4  }
  0x26   :  { %65 = dma.hbm_to_vmem [thread:$0]  %s3190_s3, 3072, %s60_s20, [#allocation9], %s2782_s28, %s2782_s28, %s2783_s9  }
  0x27   :  { %s2657_s14 = scalar_lea.hbm %s3187_s0, 256 }
  0x28   :  { %p2658_p2 = scmp.ne.s32.totalorder %s3187_s0, %s2657_s14  ;;  %p2661_p3 = scmp.lt.u32.totalorder %s2657_s14, %s3187_s0 }
  0x2a   :  { %p2663_p4 = pnand %p2661_p3, %p2658_p2 }
  0x2c   :  { %2666 = shalt.err (!%p2663_p4)
}
  0x2d   :  { %s2667_s23 = scalar_lea.vmem %s24_s22, 256  ;;  %p2672_p6 = scmp.lt.s32.totalorder %s24_s22, %s24_s22 }
  0x2e   :  { %p2668_p5 = scmp.ne.s32.totalorder %s24_s22, %s2667_s23  ;;  %p2673_p7 = scmp.lt.s32.totalorder %s2667_s23, %s2667_s23 }
  0x30   :  { %p2674_p8 = por %p2673_p7, %p2672_p6 }
  0x32   :  { %p2675_p9 = pnand %p2674_p8, %p2668_p5 }
  0x34   :  { %2678 = shalt.err (!%p2675_p9)
}
  0x35   :  { %29 = dma.hbm_to_vmem [thread:$0]  %s3187_s0, 256, %s24_s22, [#allocation3], %s2782_s28, %s2782_s28, %s2783_s9  }
  0x36   :  { %s2784_s24 = smov [#allocation7]   ;;  %s2785_s26 = smov [#allocation10]  }
  0x37   :  { %s47_s25 = sshll.u32 %s2784_s24, 4  ;;  %s75_s27 = sshll.u32 %s2785_s26, 4  ;;  %s48_s25 = int_to_ptr.vmem [resolvable:$true] %s47_s25  ;;  %s76_s27 = int_to_ptr.vmem [resolvable:$true] %s75_s27 }
  0x38   :  { %s2679_s1 = scalar_lea.hbm %s3189_s2, 2048 }
  0x39   :  { %p2680_p10 = scmp.ne.s32.totalorder %s3189_s2, %s2679_s1  ;;  %p2683_p11 = scmp.lt.u32.totalorder %s2679_s1, %s3189_s2 }
  0x3b   :  { %p2685_p12 = pnand %p2683_p11, %p2680_p10 }
  0x3d   :  { %2688 = shalt.err (!%p2685_p12)
}
  0x3e   :  { %s2689_s0 = scalar_lea.vmem %s48_s25, 2048  ;;  %p2694_p0 = scmp.lt.s32.totalorder %s48_s25, %s48_s25 }
  0x3f   :  { %p2690_p13 = scmp.ne.s32.totalorder %s48_s25, %s2689_s0  ;;  %p2695_p1 = scmp.lt.s32.totalorder %s2689_s0, %s2689_s0 }
  0x41   :  { %p2696_p2 = por %p2695_p1, %p2694_p0 }
  0x43   :  { %p2697_p3 = pnand %p2696_p2, %p2690_p13 }
  0x45   :  { %2700 = shalt.err (!%p2697_p3)
}
  0x46   :  { %53 = dma.hbm_to_vmem [thread:$0]  %s3189_s2, 2048, %s48_s25, [#allocation6], %s2782_s28, %s2782_s28, %s2783_s9  }
  0x47   :  { %s2701_s19 = scalar_lea.hbm %s3193_s6, 512 }
  0x48   :  { %p2702_p4 = scmp.ne.s32.totalorder %s3193_s6, %s2701_s19  ;;  %p2705_p5 = scmp.lt.u32.totalorder %s2701_s19, %s3193_s6 }
  0x4a   :  { %p2707_p6 = pnand %p2705_p5, %p2702_p4 }
  0x4c   :  { %2710 = shalt.err (!%p2707_p6)
}
  0x4d   :  { %s2711_s24 = scalar_lea.vmem %s76_s27, 512  ;;  %p2716_p8 = scmp.lt.s32.totalorder %s76_s27, %s76_s27 }
  0x4e   :  { %p2712_p7 = scmp.ne.s32.totalorder %s76_s27, %s2711_s24  ;;  %p2717_p9 = scmp.lt.s32.totalorder %s2711_s24, %s2711_s24 }
  0x50   :  { %p2718_p10 = por %p2717_p9, %p2716_p8 }
  0x52   :  { %p2719_p11 = pnand %p2718_p10, %p2712_p7 }
  0x54   :  { %2722 = shalt.err (!%p2719_p11)
}
  0x55   :  { %81 = dma.hbm_to_vmem [thread:$0]  %s3193_s6, 512, %s76_s27, [#allocation9], %s2778_s15, %s2778_s15, %s2779_s16  }
  0x56   :  { %s2786_s26 = smov [#allocation11]   ;;  %s2723_s10 = scalar_lea.hbm %s3194_s7, 2048 }
  0x57   :  { %s87_s29 = sshll.u32 %s2786_s26, 4  ;;  %p2724_p12 = scmp.ne.s32.totalorder %s3194_s7, %s2723_s10  ;;  %s88_s29 = int_to_ptr.vmem [resolvable:$true] %s87_s29 }
  0x58   :  { %p2727_p13 = scmp.lt.u32.totalorder %s2723_s10, %s3194_s7 }
  0x5a   :  { %p2729_p0 = pnand %p2727_p13, %p2724_p12 }
  0x5c   :  { %2732 = shalt.err (!%p2729_p0)
}
  0x5d   :  { %s2733_s22 = scalar_lea.vmem %s88_s29, 2048  ;;  %p2738_p2 = scmp.lt.s32.totalorder %s88_s29, %s88_s29 }
  0x5e   :  { %p2734_p1 = scmp.ne.s32.totalorder %s88_s29, %s2733_s22  ;;  %p2739_p3 = scmp.lt.s32.totalorder %s2733_s22, %s2733_s22 }
  0x60   :  { %p2740_p4 = por %p2739_p3, %p2738_p2 }
  0x62   :  { %p2741_p5 = pnand %p2740_p4, %p2734_p1 }
  0x64   :  { %2744 = shalt.err (!%p2741_p5)
}
  0x65   :  { %93 = dma.hbm_to_vmem [thread:$0]  %s3194_s7, 2048, %s88_s29, [#allocation12], %s2778_s15, %s2778_s15, %s2779_s16  }
  0x66   :  { %2767 = dma.done.wait [#allocation3], 256  }
  0x67   :  { %2768 = vsyncadd [#allocation3], 4294967040 }
  0x68   :  { %2769 = dma.done.wait [#allocation6], 4096  }
  0x69   :  { %2770 = vsyncadd [#allocation6], 4294963200 }
  0x6a   :  { %2771 = dma.done.wait [#allocation9], 3584  }
  0x6b   :  { %2772 = vsyncadd [#allocation9], 4294963712 }
  0x6c   :  { %2773 = dma.done.wait [#allocation12], 2048  }
  0x6d   :  { %2774 = vsyncadd [#allocation12], 4294965248  ;;  %v2787_v0 = vmov 0   ;;  %v2531_v1 = vld [vmem:[#allocation5 + $0x4] ss:$8 sps:$4 sm:$0xff]   ;;  %v2541_v8 = vld [vmem:[#allocation7 + $0x10] sm:$0xff]   ;;  %v117_v60 = vlaneseq }
  0x6e   :  { %330 = vmatprep.mubr.bf16.mxu0 %v2787_v0  ;;  %v2533_v2 = vld [vmem:[#allocation7] sm:$0xff]   ;;  %298 = vmatprep.subr.bf16.mxu0 %v2531_v1  ;;  %v2535_v4 = vld [vmem:[#allocation5 + $0x14] ss:$8 sps:$4 sm:$0xff]   ;;  %v2537_v5 = vld [vmem:[#allocation7 + $0x8] sm:$0xff]   ;;  %vm616_vm0 = vcmask 261120  }
  0x6f   :  { %v2534_v3 = vld [vmem:[#allocation5] ss:$8 sps:$4 sm:$0xff]   ;;  %2051 = vmatprep.subr.bf16.mxu1 %v2533_v2  ;;  %v2538_v6 = vld [vmem:[#allocation5 + $0x10] ss:$8 sps:$4 sm:$0xff]   ;;  %v2539_v7 = vld [vmem:[#allocation5 + $0x24] ss:$8 sps:$4 sm:$0xff]  }
  0x70   :  { %299 = vmatpush1.bf16.msra.mxu0 %v2534_v3  ;;  %2052 = vmatpush3.bf16.msra.mxu1 %v2533_v2  ;;  %v2542_v9 = vld [vmem:[#allocation5 + $0x20] ss:$8 sps:$4 sm:$0xff]   ;;  %v2543_v10 = vld [vmem:[#allocation5 + $0x34] ss:$8 sps:$4 sm:$0xff]   ;;  %v2546_v12 = vld [vmem:[#allocation5 + $0x30] ss:$8 sps:$4 sm:$0xff]  }
  0x71   :  { %300 = vmatprep.subr.bf16.mxu0 %v2535_v4  ;;  %2053 = vmatprep.subr.bf16.mxu1 %v2537_v5  ;;  %v2545_v11 = vld [vmem:[#allocation7 + $0x18] sm:$0xff]   ;;  %v2547_v13 = vld [vmem:[#allocation5 + $0x44] ss:$8 sps:$4 sm:$0xff]   ;;  %v2550_v15 = vld [vmem:[#allocation5 + $0x40] ss:$8 sps:$4 sm:$0xff]   ;;  %v2962_v61 = vshrl.u32 %v117_v60, 7 }
  0x72   :  { %v2549_v14 = vld [vmem:[#allocation7 + $0x20] sm:$0xff]   ;;  %v2551_v16 = vld [vmem:[#allocation5 + $0x54] ss:$8 sps:$4 sm:$0xff]   ;;  %v2553_v17 = vld [vmem:[#allocation7 + $0x28] sm:$0xff]  }
  0x73   :  { %v2554_v18 = vld [vmem:[#allocation5 + $0x50] ss:$8 sps:$4 sm:$0xff]   ;;  %v2555_v20 = vld [vmem:[#allocation5 + $0x64] ss:$8 sps:$4 sm:$0xff]   ;;  %v2558_v22 = vld [vmem:[#allocation5 + $0x60] ss:$8 sps:$4 sm:$0xff]  }
  0x74   :  { %301 = vmatpush1.bf16.msra.mxu0 %v2538_v6  ;;  %2054 = vmatpush3.bf16.msra.mxu1 %v2537_v5  ;;  %v2563_v19 = vld [vmem:[#allocation2] sm:$0xff]   ;;  %v2561_v24 = vld [vmem:[#allocation7 + $0x38] sm:$0xff]   ;;  %v2565_v26 = vld [vmem:[#allocation7 + $0x40] sm:$0xff]   ;;  %v120_v62 = vadd.s32 16, %v2962_v61  ;;  %v198_v63 = vsub.s32 0, %v2962_v61  ;;  %v126_v1 = vand.u32 15, %v2962_v61 }
  0x75   :  { %302 = vmatprep.subr.bf16.mxu0 %v2539_v7  ;;  %2055 = vmatprep.subr.bf16.mxu1 %v2541_v8  ;;  %v2557_v21 = vld [vmem:[#allocation7 + $0x30] sm:$0xff]   ;;  %v2564_v27 = vld [vmem:[#allocation2 + $0x8] sm:$0xff]   ;;  %v2566_v28 = vld [vmem:[#allocation7 + $0x48] sm:$0xff]   ;;  %vm582_vm1 = vcmp.lt.s32.totalorder %v2962_v61, 1  ;;  %vm599_vm4 = vcmp.lt.s32.totalorder %v2962_v61, 7 }
  0x76   :  { %2067 = vmatprep.mubr.bf16.mxu1 %v2563_v19  ;;  %v2559_v23 = vld [vmem:[#allocation5 + $0x74] ss:$8 sps:$4 sm:$0xff]   ;;  %v2562_v25 = vld [vmem:[#allocation5 + $0x70] ss:$8 sps:$4 sm:$0xff]   ;;  %v2569_v31 = vld [vmem:[#allocation7 + $0x60] sm:$0xff]   ;;  %v140_v4 = vand.u32 15, %v120_v62 }
  0x77   :  { %v2567_v29 = vld [vmem:[#allocation7 + $0x50] sm:$0xff]   ;;  %v2568_v30 = vld [vmem:[#allocation7 + $0x58] sm:$0xff]   ;;  %v2570_v32 = vld [vmem:[#allocation7 + $0x68] sm:$0xff]   ;;  %vm2976_vm2 = vcmp.ne.s32.totalorder %v126_v1, 0 }
  0x78   :  { %303 = vmatpush1.bf16.msra.mxu0 %v2542_v9  ;;  %2056 = vmatpush3.bf16.msra.mxu1 %v2541_v8  ;;  %v2571_v33 = vld [vmem:[#allocation7 + $0x70] sm:$0xff]   ;;  %v2572_v34 = vld [vmem:[#allocation7 + $0x78] sm:$0xff]   ;;  %v2926_v35 = vld [vmem:[#allocation10] sm:$0xff]  ;;  %vm2982_vm3 = vcmp.ne.s32.totalorder %v140_v4, 0 }
  0x79   :  { %304 = vmatprep.subr.bf16.mxu0 %v2543_v10  ;;  %2057 = vmatprep.subr.bf16.mxu1 %v2545_v11  ;;  %v714_v36 = vld [vmem:[#allocation11] sm:$0xff]  ;;  %v715_v37 = vld [vmem:[#allocation11 + $0x8] sm:$0xff]  ;;  %v716_v38 = vld [vmem:[#allocation11 + $0x10] sm:$0xff] }
  0x7a   :  { %v2930_v39 = vpack.c.bf16 %v715_v37, %v714_v36  ;;  %v717_v40 = vld [vmem:[#allocation11 + $0x18] sm:$0xff]  ;;  %v718_v42 = vld [vmem:[#allocation11 + $0x20] sm:$0xff]  ;;  %v719_v43 = vld [vmem:[#allocation11 + $0x28] sm:$0xff]  ;;  %v121_v37 = vadd.s32 24, %v2962_v61 }
  0x7b   :  { %v2932_v41 = vpack.c.bf16 %v717_v40, %v716_v38  ;;  %v2937_v44 = vpack.c.bf16 %v719_v43, %v718_v42  ;;  %v720_v45 = vld [vmem:[#allocation11 + $0x30] sm:$0xff]  ;;  %v721_v46 = vld [vmem:[#allocation11 + $0x38] sm:$0xff]  ;;  %v722_v48 = vld [vmem:[#allocation11 + $0x40] sm:$0xff]  ;;  %v119_v38 = vadd.s32 8, %v2962_v61 }
  0x7c   :  { %305 = vmatpush1.bf16.msra.mxu0 %v2546_v12  ;;  %2058 = vmatpush3.bf16.msra.mxu1 %v2545_v11  ;;  %v2941_v47 = vpack.c.bf16 %v721_v46, %v720_v45  ;;  %v723_v49 = vld [vmem:[#allocation11 + $0x48] sm:$0xff]  ;;  %v724_v51 = vld [vmem:[#allocation11 + $0x50] sm:$0xff]  ;;  %v725_v52 = vld [vmem:[#allocation11 + $0x58] sm:$0xff]  ;;  %v147_v40 = vand.u32 15, %v121_v37 }
  0x7d   :  { %306 = vmatprep.subr.bf16.mxu0 %v2547_v13  ;;  %2059 = vmatprep.subr.bf16.mxu1 %v2549_v14  ;;  %v2945_v50 = vpack.c.bf16 %v723_v49, %v722_v48  ;;  %v2949_v53 = vpack.c.bf16 %v725_v52, %v724_v51  ;;  %v726_v54 = vld [vmem:[#allocation11 + $0x60] sm:$0xff]  ;;  %v727_v55 = vld [vmem:[#allocation11 + $0x68] sm:$0xff]  ;;  %v728_v57 = vld [vmem:[#allocation11 + $0x70] sm:$0xff]  ;;  %v133_v43 = vand.u32 15, %v119_v38 }
  0x7e   :  { %v2953_v56 = vpack.c.bf16 %v727_v55, %v726_v54  ;;  %v729_v58 = vld [vmem:[#allocation11 + $0x78] sm:$0xff]  ;;  %vm3005_vm5 = vcmp.ne.s32.totalorder %v147_v40, 15  ;;  %v2573_v37 = vld [vmem:[#allocation8] sm:$0xff]   ;;  %v2575_v40 = vld [vmem:[#allocation8 + $0x8] sm:$0xff]  }
  0x7f   :  { %v2957_v59 = vpack.c.bf16 %v729_v58, %v728_v57  ;;  %vm3009_vm6 = vcmp.ne.s32.totalorder %v133_v43, 15  ;;  %v2574_v38 = vld [vmem:[#allocation8 + $0x40] sm:$0xff]  }
  0x80   :  { %307 = vmatpush1.bf16.msra.mxu0 %v2550_v15  ;;  %2060 = vmatpush3.bf16.msra.mxu1 %v2549_v14 }
  0x81   :  { %308 = vmatprep.subr.bf16.mxu0 %v2551_v16  ;;  %2061 = vmatprep.subr.bf16.mxu1 %v2553_v17 }
  0x84   :  { %309 = vmatpush1.bf16.msra.mxu0 %v2554_v18  ;;  %2062 = vmatpush3.bf16.msra.mxu1 %v2553_v17 }
  0x85   :  { %310 = vmatprep.subr.bf16.mxu0 %v2555_v20  ;;  %2063 = vmatprep.subr.bf16.mxu1 %v2557_v21 }
  0x88   :  { %311 = vmatpush1.bf16.msra.mxu0 %v2558_v22  ;;  %2064 = vmatpush3.bf16.msra.mxu1 %v2557_v21 }
  0x89   :  { %312 = vmatprep.subr.bf16.mxu0 %v2559_v23  ;;  %2065 = vmatprep.subr.bf16.mxu1 %v2561_v24 }
  0x8c   :  { %313 = vmatpush1.bf16.msra.mxu0 %v2562_v25  ;;  %2066 = vmatpush3.bf16.msra.mxu1 %v2561_v24 }
  0x8d   :  { %2071 = vmatprep.subr.bf16.mxu0 %v2565_v26 }
  0x8f   :  { %331 = vmatmul.mubr.bf16.vlgmr.msra.gmra.mrb[0].mxu0 %v2563_v19  ;;  %2068 = vmatmul.mubr.bf16.vlgmr.msra.gmra.mrb[0].mxu1 %v2564_v27 }
  0x90   :  { %2072 = vmatpush3.bf16.msra.mxu0 %v2565_v26  ;;  %340 = vmatprep.mubr.bf16.mxu0 %v2787_v0  ;;  %v2969_v0 = vld [vmem:[%s3191_s4] sm:$0x3] }
  0x91   :  { %2073 = vmatprep.subr.bf16.mxu0 %v2566_v28  ;;  %2099 = vmatprep.mubr.msk.f32.mxu1 %vm616_vm0, %v2926_v35  ;;  %v199_v5 = vrot.slane %v2969_v0, %v198_v63 }
  0x94   :  { %2074 = vmatpush3.bf16.msra.mxu0 %v2566_v28 }
  0x95   :  { %2075 = vmatprep.subr.bf16.mxu0 %v2567_v29 }
  0x97   :  { %341 = vmatmul.mubr.bf16.gmra.mrb[4].mxu0 %v2564_v27 }
  0x98   :  { %2076 = vmatpush3.bf16.msra.mxu0 %v2567_v29  ;;  %2087 = vmatprep.mubr.bf16.mxu0 %v2563_v19 }
  0x99   :  { %2077 = vmatprep.subr.bf16.mxu0 %v2568_v30 }
  0x9c   :  { %2078 = vmatpush3.bf16.msra.mxu0 %v2568_v30 }
  0x9d   :  { %2079 = vmatprep.subr.bf16.mxu0 %v2569_v31 }
  0xa0   :  { %2080 = vmatpush3.bf16.msra.mxu0 %v2569_v31 }
  0xa1   :  { %2081 = vmatprep.subr.bf16.mxu0 %v2570_v32 }
  0xa4   :  { %2082 = vmatpush3.bf16.msra.mxu0 %v2570_v32 }
  0xa5   :  { %2083 = vmatprep.subr.bf16.mxu0 %v2571_v33 }
  0xa8   :  { %2084 = vmatpush3.bf16.msra.mxu0 %v2571_v33 }
  0xa9   :  { %2085 = vmatprep.subr.bf16.mxu0 %v2572_v34 }
  0xac   :  { %2086 = vmatpush3.bf16.msra.mxu0 %v2572_v34 }
  0xad   :  { %2408 = vmatprep.subr.bf16.mxu0 %v2930_v39 }
  0xaf   :  { %2088 = vmatmul.mubr.bf16.vlgmr.msra.gmra.mrb[8].mxu0 %v2564_v27 }
  0xb0   :  { %2410 = vmatpush3.bf16.msra.mxu0 %v2930_v39 }
  0xb1   :  { %2412 = vmatprep.subr.bf16.mxu0 %v2932_v41 }
  0xb4   :  { %2414 = vmatpush3.bf16.msra.mxu0 %v2932_v41 }
  0xb5   :  { %2416 = vmatprep.subr.bf16.mxu0 %v2937_v44 }
  0xb8   :  { %2418 = vmatpush3.bf16.msra.mxu0 %v2937_v44 }
  0xb9   :  { %2420 = vmatprep.subr.bf16.mxu0 %v2941_v47 }
  0xbc   :  { %2422 = vmatpush3.bf16.msra.mxu0 %v2941_v47 }
  0xbd   :  { %2424 = vmatprep.subr.bf16.mxu0 %v2945_v50 }
  0xc0   :  { %2426 = vmatpush3.bf16.msra.mxu0 %v2945_v50 }
  0xc1   :  { %2428 = vmatprep.subr.bf16.mxu0 %v2949_v53 }
  0xc4   :  { %2430 = vmatpush3.bf16.msra.mxu0 %v2949_v53 }
  0xc5   :  { %2432 = vmatprep.subr.bf16.mxu0 %v2953_v56 }
  0xc8   :  { %2434 = vmatpush3.bf16.msra.mxu0 %v2953_v56 }
  0xc9   :  { %2436 = vmatprep.subr.bf16.mxu0 %v2957_v59 }
  0xcc   :  { %2438 = vmatpush3.bf16.msra.mxu0 %v2957_v59 }
  0xcd   :  { %2215 = vmatprep.subr.bf16.mxu0 %v2574_v38 }
 0x162   :  { %v332_v2 = vpop.f32.mrb[0].mxu0  ;;  %v2069_v3 = vpop.f32.mrb[0].mxu1 }
 0x163   :  { %v580_v6 = vrot.slane %v2069_v3, 7  ;;  %v2973_v7 = vpop.f32.mrb[1].mxu0  ;;  %v449_v8 = vpop.f32.mrb[1].mxu1  ;;  %v333_v18 = vadd.f32 %v332_v2, %v199_v5 }
 0x164   :  { %v578_v9 = vrot.slane %v449_v8, 7  ;;  %v336_v10 = vpop.f32.mrb[2].mxu0  ;;  %v2070_v11 = vpop.f32.mrb[2].mxu1 }
 0x165   :  { %v581_v13 = vrot.slane %v2070_v11, 7  ;;  %v2980_v14 = vpop.f32.mrb[3].mxu0  ;;  %v452_v15 = vpop.f32.mrb[3].mxu1  ;;  %v337_v19 = vadd.f32 %v336_v10, %v199_v5  ;;  %v3025_v10 = vld [vmem:[#allocation10 + $0x8] sm:$0xff]  ;;  %v3027_v11 = vld [vmem:[#allocation10 + $0x10] sm:$0xff] }
 0x166   :  { %v579_v16 = vrot.slane %v452_v15, 7 }
 0x167   :  { %v586_v20 = vsel %vm582_vm1, %v581_v13, %v578_v9  ;;  %v583_v21 = vsel %vm582_vm1, %v580_v6, %v581_v13  ;;  %v3034_v13 = vld [vmem:[#allocation10 + $0x18] sm:$0xff] }
 0x168   :  { %v587_v22 = vsel %vm2976_vm2, %v586_v20, 0.0  ;;  %v585_v23 = vsel %vm582_vm1, %v578_v9, %v579_v16  ;;  %v584_v24 = vsel %vm582_vm1, %v579_v16, %v580_v6 }
 0x169   :  { %v591_v25 = vadd.f32 %v587_v22, %v333_v18  ;;  %v592_v26 = vadd.f32 %v585_v23, %v337_v19  ;;  %v589_v28 = vsel %vm2982_vm3, %v584_v24, 0.0 }
 0x16a   :  { %v342_v27 = vpop.f32.mrb[4].mxu0 }
 0x16b   :  { %v343_v29 = vadd.f32 %v342_v27, %v199_v5  ;;  %v2998_v30 = vpop.f32.mrb[5].mxu0 }
 0x16c   :  { %v346_v31 = vpop.f32.mrb[6].mxu0 }
 0x16d   :  { %v593_v32 = vadd.f32 %v589_v28, %v343_v29  ;;  %v347_v33 = vadd.f32 %v346_v31, %v199_v5  ;;  %v3000_v34 = vpop.f32.mrb[7].mxu0 }
 0x16f   :  { %v594_v36 = vadd.f32 %v583_v21, %v347_v33 }
 0x182   :  { %v2089_v42 = vpop.f32.mrb[8].mxu0 }
 0x183   :  { %v563_v45 = vpop.f32.mrb[9].mxu0  ;;  %v597_v49 = vrot.slane %v2089_v42, 1 }
 0x184   :  { %v595_v46 = vrot.slane %v563_v45, 1  ;;  %v2090_v48 = vpop.f32.mrb[10].mxu0  ;;  %v2576_v45 = vld [vmem:[#allocation8 + $0x48] sm:$0xff]  }
 0x185   :  { %v598_v52 = vrot.slane %v2090_v48, 1  ;;  %v566_v54 = vpop.f32.mrb[11].mxu0 }
 0x186   :  { %v596_v57 = vrot.slane %v566_v54, 1  ;;  %v2579_v54 = vld [vmem:[#allocation8 + $0x18] sm:$0xff]  }
 0x187   :  { %v600_v58 = vsel %vm599_vm4, %v597_v49, %v598_v52  ;;  %v603_v60 = vsel %vm599_vm4, %v598_v52, %v595_v46  ;;  %v2578_v52 = vld [vmem:[#allocation8 + $0x50] sm:$0xff]  }
 0x188   :  { %v607_v62 = vsel %vm3005_vm5, %v603_v60, 0.0  ;;  %v601_v63 = vsel %vm599_vm4, %v596_v57, %v597_v49  ;;  %v602_v1 = vsel %vm599_vm4, %v595_v46, %v596_v57  ;;  %v610_v2 = vadd.f32 %v600_v58, %v593_v32  ;;  %v2577_v49 = vld [vmem:[#allocation8 + $0x10] sm:$0xff]   ;;  %v2580_v57 = vld [vmem:[#allocation8 + $0x58] sm:$0xff]   ;;  %v2581_v58 = vld [vmem:[#allocation8 + $0x20] sm:$0xff]  }
 0x189   :  { %v605_v3 = vsel %vm3009_vm6, %v601_v63, 0.0  ;;  %v608_v4 = vadd.f32 %v602_v1, %v591_v25  ;;  %v611_v5 = vadd.f32 %v607_v62, %v594_v36  ;;  %v2582_v60 = vld [vmem:[#allocation8 + $0x60] sm:$0xff]   ;;  %v2583_v62 = vld [vmem:[#allocation8 + $0x28] sm:$0xff]   ;;  %v2585_v1 = vld [vmem:[#allocation8 + $0x30] sm:$0xff]  }
 0x18a   :  { %v609_v6 = vadd.f32 %v605_v3, %v592_v26  ;;  %v2584_v63 = vld [vmem:[#allocation8 + $0x68] sm:$0xff]   ;;  %v2587_v3 = vld [vmem:[#allocation8 + $0x38] sm:$0xff]  }
 0x18b   :  { %v2363_v9 = vpack.c.bf16 %v611_v5, %v610_v2 }
 0x18c   :  { %v2359_v8 = vpack.c.bf16 %v609_v6, %v608_v4 }
 0x18e   :  { %2360 = vmatprep.subr.bf16.mxu1 %v2359_v8 }
 0x18f   :  { %2362 = vmatpush3.bf16.msra.mxu1 %v2359_v8 }
 0x190   :  { %2364 = vmatprep.subr.bf16.mxu1 %v2363_v9 }
 0x193   :  { %2366 = vmatpush3.bf16.msra.mxu1 %v2363_v9 }
 0x194   :  { %2368 = vmatprep.subr.bf16.mxu1 %v2930_v39 }
 0x196   :  { %2100 = vmatmul.mubr.msk.f32.vlgmr.msra.gmra.mrb[4].mxu1 %vm616_vm0, %v3025_v10 }
 0x197   :  { %2102 = vmatprep.mubr.msk.f32.mxu1 %vm616_vm0, %v3027_v11  ;;  %2370 = vmatpush3.bf16.msra.mxu1 %v2930_v39 }
 0x198   :  { %2372 = vmatprep.subr.bf16.mxu1 %v2932_v41 }
 0x19a   :  { %2103 = vmatmul.mubr.msk.f32.gmra.mrb[6].mxu1 %vm616_vm0, %v3034_v13 }
 0x19b   :  { %2374 = vmatpush3.bf16.msra.mxu1 %v2932_v41 }
 0x19c   :  { %2376 = vmatprep.subr.bf16.mxu1 %v2937_v44 }
 0x19f   :  { %2378 = vmatpush3.bf16.msra.mxu1 %v2937_v44 }
 0x1a0   :  { %2380 = vmatprep.subr.bf16.mxu1 %v2941_v47 }
 0x1a3   :  { %2382 = vmatpush3.bf16.msra.mxu1 %v2941_v47 }
 0x1a4   :  { %2384 = vmatprep.subr.bf16.mxu1 %v2945_v50 }
 0x1a7   :  { %2386 = vmatpush3.bf16.msra.mxu1 %v2945_v50 }
 0x1a8   :  { %2388 = vmatprep.subr.bf16.mxu1 %v2949_v53 }
 0x1ab   :  { %2390 = vmatpush3.bf16.msra.mxu1 %v2949_v53 }
 0x1ac   :  { %2392 = vmatprep.subr.bf16.mxu1 %v2953_v56 }
 0x1af   :  { %2394 = vmatpush3.bf16.msra.mxu1 %v2953_v56 }
 0x1b0   :  { %2396 = vmatprep.subr.bf16.mxu1 %v2957_v59 }
 0x1b3   :  { %2398 = vmatpush3.bf16.msra.mxu1 %v2957_v59 }
 0x269   :  { %v2101_v15 = vpop.f32.mrb[4].mxu1 }
 0x26a   :  { %v695_v16 = vpop.f32.mrb[5].mxu1 }
 0x26b   :  { %2137 = vmatprep.mubr.f32.mxu1 %v695_v16 }
 0x26c   :  { %2138 = vmatmul.mubr.f32.vlgmr.msra.gmra.mrb[8].mxu1 %v2101_v15 }
 0x26d   :  { %v2104_v18 = vpop.f32.mrb[6].mxu1 }
 0x26e   :  { %v705_v19 = vpop.f32.mrb[7].mxu1 }
 0x26f   :  { %2140 = vmatprep.mubr.f32.mxu1 %v705_v19 }
 0x270   :  { %2141 = vmatmul.mubr.f32.gmra.mrb[10].mxu1 %v2104_v18 }
 0x271   :  { %2151 = vmatprep.mubr.msk.f32.mxu1 %vm616_vm0, %v2926_v35 }
 0x33f   :  { %v2139_v20 = vpop.f32.mrb[8].mxu1 }
 0x340   :  { %v3055_v21 = vsub.f32 %v609_v6, %v2139_v20  ;;  %v796_v22 = vpop.f32.mrb[9].mxu1 }
 0x341   :  { %v3057_v23 = vsub.f32 %v608_v4, %v796_v22  ;;  %v2588_v4 = vld [vmem:[#allocation8 + $0x78] sm:$0xff]  }
 0x342   :  { %v820_v24 = vmul.f32 %v3055_v21, %v3055_v21 }
 0x343   :  { %v819_v25 = vmul.f32 %v3057_v23, %v3057_v23  ;;  %v2142_v26 = vpop.f32.mrb[10].mxu1 }
 0x344   :  { %v3063_v27 = vsub.f32 %v611_v5, %v2142_v26  ;;  %v806_v28 = vpop.f32.mrb[11].mxu1  ;;  %v2589_v5 = vld [vmem:[#allocation8 + $0x80] sm:$0xff]  }
 0x345   :  { %v3065_v29 = vsub.f32 %v610_v2, %v806_v28  ;;  %v2399_v31 = vpack.c.bf16 %v820_v24, %v819_v25  ;;  %v2586_v2 = vld [vmem:[#allocation8 + $0x70] sm:$0xff]  }
 0x346   :  { %v822_v32 = vmul.f32 %v3063_v27, %v3063_v27 }
 0x347   :  { %v821_v33 = vmul.f32 %v3065_v29, %v3065_v29  ;;  %2400 = vmatprep.subr.bf16.mxu1 %v2399_v31 }
 0x348   :  { %2402 = vmatpush3.bf16.msra.mxu1 %v2399_v31 }
 0x349   :  { %v2403_v36 = vpack.c.bf16 %v822_v32, %v821_v33 }
 0x34b   :  { %2404 = vmatprep.subr.bf16.mxu1 %v2403_v36 }
 0x34c   :  { %2406 = vmatpush3.bf16.msra.mxu1 %v2403_v36 }
 0x34d   :  { %2195 = vmatprep.subr.bf16.mxu1 %v2573_v37 }
 0x34f   :  { %2152 = vmatmul.mubr.msk.f32.vlgmr.msra.gmra.mrb[12].mxu1 %vm616_vm0, %v3025_v10 }
 0x350   :  { %2154 = vmatprep.mubr.msk.f32.mxu1 %vm616_vm0, %v3027_v11  ;;  %2196 = vmatpush3.bf16.msra.mxu1 %v2573_v37 }
 0x351   :  { %2197 = vmatprep.subr.bf16.mxu1 %v2575_v40 }
 0x353   :  { %2155 = vmatmul.mubr.msk.f32.gmra.mrb[14].mxu1 %vm616_vm0, %v3034_v13 }
 0x354   :  { %2198 = vmatpush3.bf16.msra.mxu1 %v2575_v40 }
 0x355   :  { %2199 = vmatprep.subr.bf16.mxu1 %v2577_v49 }
 0x358   :  { %2200 = vmatpush3.bf16.msra.mxu1 %v2577_v49 }
 0x359   :  { %2201 = vmatprep.subr.bf16.mxu1 %v2579_v54 }
 0x35c   :  { %2202 = vmatpush3.bf16.msra.mxu1 %v2579_v54 }
 0x35d   :  { %2203 = vmatprep.subr.bf16.mxu1 %v2581_v58 }
 0x360   :  { %2204 = vmatpush3.bf16.msra.mxu1 %v2581_v58 }
 0x361   :  { %2205 = vmatprep.subr.bf16.mxu1 %v2583_v62 }
 0x364   :  { %2206 = vmatpush3.bf16.msra.mxu1 %v2583_v62 }
 0x365   :  { %2207 = vmatprep.subr.bf16.mxu1 %v2585_v1 }
 0x368   :  { %2208 = vmatpush3.bf16.msra.mxu1 %v2585_v1 }
 0x369   :  { %2209 = vmatprep.subr.bf16.mxu1 %v2587_v3 }
 0x36c   :  { %2210 = vmatpush3.bf16.msra.mxu1 %v2587_v3 }
 0x36d   :  { %2235 = vmatprep.subr.bf16.mxu1 %v2589_v5 }
 0x422   :  { %v2153_v42 = vpop.f32.mrb[12].mxu1 }
 0x423   :  { %v889_v43 = vpop.f32.mrb[13].mxu1 }
 0x424   :  { %2189 = vmatprep.mubr.f32.mxu0 %v889_v43 }
 0x425   :  { %2190 = vmatmul.mubr.f32.vlgmr.msra.gmra.mrb[12].mxu0 %v2153_v42 }
 0x426   :  { %v2156_v46 = vpop.f32.mrb[14].mxu1  ;;  %2216 = vmatpush3.bf16.msra.mxu0 %v2574_v38 }
 0x427   :  { %v899_v48 = vpop.f32.mrb[15].mxu1  ;;  %2217 = vmatprep.subr.bf16.mxu0 %v2576_v45 }
 0x428   :  { %2192 = vmatprep.mubr.f32.mxu0 %v899_v48  ;;  %v2596_v48 = vld [vmem:[#allocation8 + $0xb8] sm:$0xff]  }
 0x429   :  { %2193 = vmatmul.mubr.f32.gmra.mrb[14].mxu0 %v2156_v46  ;;  %v2595_v46 = vld [vmem:[#allocation8 + $0xb0] sm:$0xff]  }
 0x42a   :  { %2218 = vmatpush3.bf16.msra.mxu0 %v2576_v45  ;;  %v2590_v45 = vld [vmem:[#allocation8 + $0x88] sm:$0xff]  }
 0x42b   :  { %2219 = vmatprep.subr.bf16.mxu0 %v2578_v52 }
 0x42e   :  { %2220 = vmatpush3.bf16.msra.mxu0 %v2578_v52 }
 0x42f   :  { %2221 = vmatprep.subr.bf16.mxu0 %v2580_v57 }
 0x432   :  { %2222 = vmatpush3.bf16.msra.mxu0 %v2580_v57 }
 0x433   :  { %2223 = vmatprep.subr.bf16.mxu0 %v2582_v60 }
 0x436   :  { %2224 = vmatpush3.bf16.msra.mxu0 %v2582_v60 }
 0x437   :  { %2225 = vmatprep.subr.bf16.mxu0 %v2584_v63 }
 0x43a   :  { %2226 = vmatpush3.bf16.msra.mxu0 %v2584_v63 }
 0x43b   :  { %2227 = vmatprep.subr.bf16.mxu0 %v2586_v2 }
 0x43e   :  { %2228 = vmatpush3.bf16.msra.mxu0 %v2586_v2 }
 0x43f   :  { %2229 = vmatprep.subr.bf16.mxu0 %v2588_v4 }
 0x442   :  { %2230 = vmatpush3.bf16.msra.mxu0 %v2588_v4 }
 0x4f8   :  { %v2191_v6 = vpop.f32.mrb[12].mxu0 }
 0x4f9   :  { %v980_v8 = vadd.f32 1e-05, %v2191_v6  ;;  %v974_v9 = vpop.f32.mrb[13].mxu0 }
 0x4fa   :  { %v975_v15 = vadd.f32 1e-05, %v974_v9 }
 0x4fb   :  { %2597 = vrsqrt.f32 %v980_v8 }
 0x4fc   :  { %2599 = vrsqrt.f32 %v975_v15  ;;  %v2194_v16 = vpop.f32.mrb[14].mxu0 }
 0x4fd   :  { %v990_v18 = vadd.f32 1e-05, %v2194_v16  ;;  %v984_v19 = vpop.f32.mrb[15].mxu0 }
 0x4fe   :  { %v985_v20 = vadd.f32 1e-05, %v984_v19 }
 0x4ff   :  { %2601 = vrsqrt.f32 %v990_v18 }
 0x500   :  { %2603 = vrsqrt.f32 %v985_v20 }
 0x505   :  { %v2598_v22 = vpop.eup %2597 }
 0x506   :  { %v2600_v24 = vpop.eup %2599  ;;  %v998_v25 = vmul.f32 %v2598_v22, %v3055_v21  ;;  %v2591_v21 = vld [vmem:[#allocation8 + $0x90] sm:$0xff]  }
 0x507   :  { %v997_v26 = vmul.f32 %v2600_v24, %v3057_v23  ;;  %v2592_v23 = vld [vmem:[#allocation8 + $0x98] sm:$0xff]  }
 0x508   :  { %v1002_v28 = vmax.f32 %v998_v25, 0.0 }
 0x509   :  { %v2602_v31 = vpop.eup %2601  ;;  %v1001_v32 = vmax.f32 %v997_v26, 0.0 }
 0x50a   :  { %v2604_v33 = vpop.eup %2603  ;;  %v1000_v36 = vmul.f32 %v2602_v31, %v3063_v27  ;;  %v2593_v27 = vld [vmem:[#allocation8 + $0xa0] sm:$0xff]  }
 0x50b   :  { %v999_v37 = vmul.f32 %v2604_v33, %v3065_v29  ;;  %v1005_v38 = vpack.c.bf16 %v1002_v28, %v1001_v32  ;;  %v2594_v29 = vld [vmem:[#allocation8 + $0xa8] sm:$0xff]  }
 0x50c   :  { %v1004_v40 = vmax.f32 %v1000_v36, 0.0 }
 0x50d   :  { %v1003_v42 = vmax.f32 %v999_v37, 0.0  ;;  %2211 = vmatprep.mubr.bf16.mxu1 %v1005_v38  ;;  %2231 = vmatprep.mubr.bf16.mxu0 %v1005_v38 }
 0x50f   :  { %v1006_v43 = vpack.c.bf16 %v1004_v40, %v1003_v42 }
 0x511   :  { %2212 = vmatmul.mubr.bf16.vlgmr.msra.gmra.mrb[16].mxu1 %v1006_v43  ;;  %2232 = vmatmul.mubr.bf16.vlgmr.msra.gmra.mrb[16].mxu0 %v1006_v43 }
 0x512   :  { %2236 = vmatpush3.bf16.msra.mxu1 %v2589_v5  ;;  %2251 = vmatprep.mubr.bf16.mxu1 %v1005_v38 }
 0x513   :  { %2237 = vmatprep.subr.bf16.mxu1 %v2590_v45  ;;  %2263 = vmatprep.mubr.msk.f32.mxu0 %vm616_vm0, %v2926_v35 }
 0x516   :  { %2238 = vmatpush3.bf16.msra.mxu1 %v2590_v45 }
 0x517   :  { %2239 = vmatprep.subr.bf16.mxu1 %v2591_v21 }
 0x51a   :  { %2240 = vmatpush3.bf16.msra.mxu1 %v2591_v21 }
 0x51b   :  { %2241 = vmatprep.subr.bf16.mxu1 %v2592_v23 }
 0x51e   :  { %2242 = vmatpush3.bf16.msra.mxu1 %v2592_v23 }
 0x51f   :  { %2243 = vmatprep.subr.bf16.mxu1 %v2593_v27 }
 0x522   :  { %2244 = vmatpush3.bf16.msra.mxu1 %v2593_v27 }
 0x523   :  { %2245 = vmatprep.subr.bf16.mxu1 %v2594_v29 }
 0x526   :  { %2246 = vmatpush3.bf16.msra.mxu1 %v2594_v29 }
 0x527   :  { %2247 = vmatprep.subr.bf16.mxu1 %v2595_v46 }
 0x52a   :  { %2248 = vmatpush3.bf16.msra.mxu1 %v2595_v46 }
 0x52b   :  { %2249 = vmatprep.subr.bf16.mxu1 %v2596_v48 }
 0x52e   :  { %2250 = vmatpush3.bf16.msra.mxu1 %v2596_v48 }
 0x52f   :  { %2448 = vmatprep.subr.bf16.mxu1 %v2930_v39 }
 0x531   :  { %2252 = vmatmul.mubr.bf16.vlgmr.msra.gmra.mrb[20].mxu1 %v1006_v43  ;;  %v1861_v43 = vld [vmem:[%s3192_s5] ss:$0 sm:$0xff]  ;;  %s2788_s5 = smov [#allocation13]  }
 0x532   :  { %2450 = vmatpush3.bf16.msra.mxu1 %v2930_v39  ;;  %s1780_s14 = sshll.u32 %s2788_s5, 4  ;;  %s1781_s14 = int_to_ptr.vmem [resolvable:$true] %s1780_s14 }
 0x533   :  { %2452 = vmatprep.subr.bf16.mxu1 %v2932_v41  ;;  %s2745_s17 = scalar_lea.vmem %s1781_s14, 256  ;;  %p2750_p7 = scmp.lt.s32.totalorder %s1781_s14, %s1781_s14 }
 0x534   :  { %p2746_p6 = scmp.ne.s32.totalorder %s1781_s14, %s2745_s17  ;;  %p2751_p8 = scmp.lt.s32.totalorder %s2745_s17, %s2745_s17 }
 0x536   :  { %2454 = vmatpush3.bf16.msra.mxu1 %v2932_v41  ;;  %p2752_p9 = por %p2751_p8, %p2750_p7 }
 0x537   :  { %2456 = vmatprep.subr.bf16.mxu1 %v2937_v44 }
 0x538   :  { %p2753_p10 = pnand %p2752_p9, %p2746_p6 }
 0x53a   :  { %2458 = vmatpush3.bf16.msra.mxu1 %v2937_v44 }
 0x53b   :  { %2460 = vmatprep.subr.bf16.mxu1 %v2941_v47 }
 0x53e   :  { %2462 = vmatpush3.bf16.msra.mxu1 %v2941_v47 }
 0x53f   :  { %2464 = vmatprep.subr.bf16.mxu1 %v2945_v50 }
 0x542   :  { %2466 = vmatpush3.bf16.msra.mxu1 %v2945_v50 }
 0x543   :  { %2468 = vmatprep.subr.bf16.mxu1 %v2949_v53 }
 0x546   :  { %2470 = vmatpush3.bf16.msra.mxu1 %v2949_v53 }
 0x547   :  { %2472 = vmatprep.subr.bf16.mxu1 %v2953_v56 }
 0x54a   :  { %2474 = vmatpush3.bf16.msra.mxu1 %v2953_v56 }
 0x54b   :  { %2476 = vmatprep.subr.bf16.mxu1 %v2957_v59 }
 0x54e   :  { %2478 = vmatpush3.bf16.msra.mxu1 %v2957_v59 }
 0x5e4   :  { %v2213_v49 = vpop.f32.mrb[16].mxu1  ;;  %v2233_v52 = vpop.f32.mrb[16].mxu0 }
 0x5e5   :  { %v1105_v54 = vpop.f32.mrb[17].mxu1  ;;  %v1219_v57 = vpop.f32.mrb[17].mxu0  ;;  %v1350_v63 = vrot.slane %v2213_v49, 7 }
 0x5e6   :  { %v1348_v58 = vrot.slane %v1105_v54, 7  ;;  %v2214_v60 = vpop.f32.mrb[18].mxu1  ;;  %v2234_v62 = vpop.f32.mrb[18].mxu0 }
 0x5e7   :  { %v1351_v1 = vrot.slane %v2214_v60, 7  ;;  %v1108_v2 = vpop.f32.mrb[19].mxu1  ;;  %v1222_v3 = vpop.f32.mrb[19].mxu0 }
 0x5e8   :  { %v1349_v4 = vrot.slane %v1108_v2, 7 }
 0x5e9   :  { %v1355_v5 = vsel %vm582_vm1, %v1351_v1, %v1348_v58  ;;  %v1352_v6 = vsel %vm582_vm1, %v1350_v63, %v1351_v1 }
 0x5ea   :  { %v1356_v8 = vsel %vm2976_vm2, %v1355_v5, 0.0  ;;  %v1363_v9 = vadd.f32 %v2234_v62, %v1352_v6  ;;  %v1353_v15 = vsel %vm582_vm1, %v1349_v4, %v1350_v63  ;;  %v1354_v16 = vsel %vm582_vm1, %v1348_v58, %v1349_v4 }
 0x5eb   :  { %v1360_v18 = vadd.f32 %v1356_v8, %v1219_v57  ;;  %v1358_v19 = vsel %vm2982_vm3, %v1353_v15, 0.0  ;;  %v1361_v20 = vadd.f32 %v1354_v16, %v1222_v3 }
 0x5ec   :  { %v1362_v22 = vadd.f32 %v2233_v52, %v1358_v19 }
 0x604   :  { %v2253_v24 = vpop.f32.mrb[20].mxu1 }
 0x605   :  { %v1333_v25 = vpop.f32.mrb[21].mxu1  ;;  %v1366_v31 = vrot.slane %v2253_v24, 1 }
 0x606   :  { %v1364_v26 = vrot.slane %v1333_v25, 1  ;;  %v2254_v28 = vpop.f32.mrb[22].mxu1 }
 0x607   :  { %v1367_v12 = vrot.slane %v2254_v28, 1  ;;  %v1336_v32 = vpop.f32.mrb[23].mxu1 }
 0x608   :  { %v1365_v33 = vrot.slane %v1336_v32, 1 }
 0x609   :  { %v1368_v36 = vsel %vm599_vm4, %v1366_v31, %v1367_v12  ;;  %v1371_v37 = vsel %vm599_vm4, %v1367_v12, %v1364_v26 }
 0x60a   :  { %v1375_v17 = vsel %vm3005_vm5, %v1371_v37, 0.0  ;;  %v1378_v38 = vadd.f32 %v1368_v36, %v1362_v22  ;;  %v1369_v40 = vsel %vm599_vm4, %v1365_v33, %v1366_v31  ;;  %v1370_v42 = vsel %vm599_vm4, %v1364_v26, %v1365_v33 }
 0x60b   :  { %v1379_v45 = vadd.f32 %v1375_v17, %v1363_v9  ;;  %v1373_v21 = vsel %vm3009_vm6, %v1369_v40, 0.0  ;;  %v1376_v23 = vadd.f32 %v1370_v42, %v1360_v18 }
 0x60c   :  { %v1377_v27 = vadd.f32 %v1373_v21, %v1361_v20  ;;  %v1389_v46 = vadd.f32 %v1861_v43, %v1378_v38 }
 0x60d   :  { %v1387_v29 = vadd.f32 %v1861_v43, %v1376_v23  ;;  %v1390_v48 = vadd.f32 %v1861_v43, %v1379_v45 }
 0x60e   :  { %v1388_v51 = vadd.f32 %v1861_v43, %v1377_v27 }
 0x60f   :  { %v2443_v52 = vpack.c.bf16 %v1390_v48, %v1389_v46 }
 0x610   :  { %v2439_v49 = vpack.c.bf16 %v1388_v51, %v1387_v29 }
 0x612   :  { %2440 = vmatprep.subr.bf16.mxu0 %v2439_v49 }
 0x613   :  { %2442 = vmatpush3.bf16.msra.mxu0 %v2439_v49 }
 0x614   :  { %2444 = vmatprep.subr.bf16.mxu0 %v2443_v52 }
 0x617   :  { %2446 = vmatpush3.bf16.msra.mxu0 %v2443_v52 }
 0x61a   :  { %2264 = vmatmul.mubr.msk.f32.vlgmr.msra.gmra.mrb[20].mxu0 %vm616_vm0, %v3025_v10 }
 0x61b   :  { %2266 = vmatprep.mubr.msk.f32.mxu0 %vm616_vm0, %v3027_v11 }
 0x61e   :  { %2267 = vmatmul.mubr.msk.f32.gmra.mrb[22].mxu0 %vm616_vm0, %v3034_v13 }
 0x61f   :  { %2315 = vmatprep.mubr.msk.f32.mxu0 %vm616_vm0, %v2926_v35 }
 0x6ed   :  { %v2265_v55 = vpop.f32.mrb[20].mxu0 }
 0x6ee   :  { %v1457_v54 = vpop.f32.mrb[21].mxu0 }
 0x6ef   :  { %2301 = vmatprep.mubr.f32.mxu1 %v1457_v54 }
 0x6f0   :  { %2302 = vmatmul.mubr.f32.vlgmr.msra.gmra.mrb[24].mxu1 %v2265_v55 }
 0x6f1   :  { %v2268_v57 = vpop.f32.mrb[22].mxu0 }
 0x6f2   :  { %v1467_v58 = vpop.f32.mrb[23].mxu0 }
 0x6f3   :  { %2304 = vmatprep.mubr.f32.mxu1 %v1467_v58 }
 0x6f4   :  { %2305 = vmatmul.mubr.f32.gmra.mrb[26].mxu1 %v2268_v57 }
 0x7c3   :  { %v2303_v60 = vpop.f32.mrb[24].mxu1 }
 0x7c4   :  { %v1562_v62 = vsub.f32 %v1388_v51, %v2303_v60  ;;  %v1542_v63 = vpop.f32.mrb[25].mxu1 }
 0x7c5   :  { %v1561_v1 = vsub.f32 %v1387_v29, %v1542_v63 }
 0x7c6   :  { %v1566_v2 = vmul.f32 %v1562_v62, %v1562_v62 }
 0x7c7   :  { %v1565_v3 = vmul.f32 %v1561_v1, %v1561_v1  ;;  %v2306_v4 = vpop.f32.mrb[26].mxu1 }
 0x7c8   :  { %v3134_v5 = vsub.f32 %v1390_v48, %v2306_v4  ;;  %v1552_v6 = vpop.f32.mrb[27].mxu1 }
 0x7c9   :  { %v3136_v8 = vsub.f32 %v1389_v46, %v1552_v6  ;;  %v2479_v35 = vpack.c.bf16 %v1566_v2, %v1565_v3 }
 0x7ca   :  { %v1568_v9 = vmul.f32 %v3134_v5, %v3134_v5 }
 0x7cb   :  { %v1567_v15 = vmul.f32 %v3136_v8, %v3136_v8  ;;  %2480 = vmatprep.subr.bf16.mxu0 %v2479_v35 }
 0x7cc   :  { %2482 = vmatpush3.bf16.msra.mxu0 %v2479_v35 }
 0x7cd   :  { %v2483_v16 = vpack.c.bf16 %v1568_v9, %v1567_v15 }
 0x7cf   :  { %2484 = vmatprep.subr.bf16.mxu0 %v2483_v16 }
 0x7d0   :  { %2486 = vmatpush3.bf16.msra.mxu0 %v2483_v16 }
 0x7d1   :  { %2488 = vmatprep.subr.bf16.mxu0 %v2930_v39 }
 0x7d3   :  { %2316 = vmatmul.mubr.msk.f32.vlgmr.msra.gmra.mrb[24].mxu0 %vm616_vm0, %v3025_v10 }
 0x7d4   :  { %2318 = vmatprep.mubr.msk.f32.mxu0 %vm616_vm0, %v3027_v11  ;;  %2490 = vmatpush3.bf16.msra.mxu0 %v2930_v39 }
 0x7d5   :  { %2492 = vmatprep.subr.bf16.mxu0 %v2932_v41 }
 0x7d7   :  { %2319 = vmatmul.mubr.msk.f32.gmra.mrb[26].mxu0 %vm616_vm0, %v3034_v13 }
 0x7d8   :  { %2494 = vmatpush3.bf16.msra.mxu0 %v2932_v41 }
 0x7d9   :  { %2496 = vmatprep.subr.bf16.mxu0 %v2937_v44 }
 0x7dc   :  { %2498 = vmatpush3.bf16.msra.mxu0 %v2937_v44 }
 0x7dd   :  { %2500 = vmatprep.subr.bf16.mxu0 %v2941_v47 }
 0x7e0   :  { %2502 = vmatpush3.bf16.msra.mxu0 %v2941_v47 }
 0x7e1   :  { %2504 = vmatprep.subr.bf16.mxu0 %v2945_v50 }
 0x7e4   :  { %2506 = vmatpush3.bf16.msra.mxu0 %v2945_v50 }
 0x7e5   :  { %2508 = vmatprep.subr.bf16.mxu0 %v2949_v53 }
 0x7e8   :  { %2510 = vmatpush3.bf16.msra.mxu0 %v2949_v53 }
 0x7e9   :  { %2512 = vmatprep.subr.bf16.mxu0 %v2953_v56 }
 0x7ec   :  { %2514 = vmatpush3.bf16.msra.mxu0 %v2953_v56 }
 0x7ed   :  { %2516 = vmatprep.subr.bf16.mxu0 %v2957_v59 }
 0x7f0   :  { %2518 = vmatpush3.bf16.msra.mxu0 %v2957_v59  ;;  %v202_v59 = vsub.s32 1, %v2962_v61 }
 0x7f2   :  { %v203_v20 = vrot.slane %v2969_v0, %v202_v59 }
 0x7f4   :  { %v339_v25 = vadd.f32 %v2980_v14, %v203_v20  ;;  %v335_v28 = vadd.f32 %v2973_v7, %v203_v20  ;;  %v349_v37 = vadd.f32 %v3000_v34, %v203_v20  ;;  %v345_v38 = vadd.f32 %v2998_v30, %v203_v20 }
 0x8a6   :  { %v2317_v39 = vpop.f32.mrb[24].mxu0 }
 0x8a7   :  { %v1635_v41 = vpop.f32.mrb[25].mxu0 }
 0x8a8   :  { %2353 = vmatprep.mubr.f32.mxu0 %v1635_v41 }
 0x8a9   :  { %2354 = vmatmul.mubr.f32.vlgmr.msra.gmra.mrb[28].mxu0 %v2317_v39 }
 0x8aa   :  { %v2320_v44 = vpop.f32.mrb[26].mxu0 }
 0x8ab   :  { %v1645_v47 = vpop.f32.mrb[27].mxu0 }
 0x8ac   :  { %2356 = vmatprep.mubr.f32.mxu0 %v1645_v47 }
 0x8ad   :  { %2357 = vmatmul.mubr.f32.gmra.mrb[30].mxu0 %v2320_v44 }
 0x97c   :  { %v2355_v50 = vpop.f32.mrb[28].mxu0 }
 0x97d   :  { %v1726_v10 = vadd.f32 1e-05, %v2355_v50  ;;  %v1720_v11 = vpop.f32.mrb[29].mxu0 }
 0x97e   :  { %v1721_v53 = vadd.f32 1e-05, %v1720_v11 }
 0x97f   :  { %2605 = vrsqrt.f32 %v1726_v10 }
 0x980   :  { %2607 = vrsqrt.f32 %v1721_v53  ;;  %v2358_v13 = vpop.f32.mrb[30].mxu0 }
 0x981   :  { %v1736_v56 = vadd.f32 1e-05, %v2358_v13  ;;  %v1730_v18 = vpop.f32.mrb[31].mxu0 }
 0x982   :  { %v1731_v19 = vadd.f32 1e-05, %v1730_v18 }
 0x983   :  { %2609 = vrsqrt.f32 %v1736_v56 }
 0x984   :  { %2611 = vrsqrt.f32 %v1731_v19 }
 0x989   :  { %v2606_v22 = vpop.eup %2605 }
 0x98a   :  { %v2608_v24 = vpop.eup %2607  ;;  %v1744_v26 = vmul.f32 %v2606_v22, %v1562_v62 }
 0x98b   :  { %v1743_v31 = vmul.f32 %v2608_v24, %v1561_v1 }
 0x98c   :  { %v1748_v12 = vadd.f32 %v1744_v26, %v339_v25 }
 0x98d   :  { %v2610_v32 = vpop.eup %2609  ;;  %v1747_v33 = vadd.f32 %v1743_v31, %v335_v28 }
 0x98e   :  { %v2612_v36 = vpop.eup %2611  ;;  %v1746_v61 = vmul.f32 %v2610_v32, %v3134_v5  ;;  %v1752_v17 = vmax.f32 %v1748_v12, 0.0 }
 0x98f   :  { %v1745_v0 = vmul.f32 %v2612_v36, %v3136_v8  ;;  %v1751_v40 = vmax.f32 %v1747_v33, 0.0 }
 0x990   :  { %v1750_v42 = vadd.f32 %v1746_v61, %v349_v37 }
 0x991   :  { %v1749_v14 = vadd.f32 %v1745_v0, %v345_v38  ;;  %v1881_v43 = vpack.c.bf16 %v1752_v17, %v1751_v40 }
 0x992   :  { %v1754_v45 = vmax.f32 %v1750_v42, 0.0 }
 0x993   :  { %v1753_v7 = vmax.f32 %v1749_v14, 0.0  ;;  %1882 = vst [vmem:[#allocation13] sm:$0xff] %v1881_v43  }
 0x995   :  { %v1886_v21 = vpack.c.bf16 %v1754_v45, %v1753_v7 }
 0x997   :  { %1888 = vst [vmem:[#allocation13 + $0x8] sm:$0xff] %v1886_v21  }
 0x998   :  { %2756 = shalt.err (!%p2753_p10)
}
 0x999   :  { %s2757_s21 = scalar_lea.hbm %s3195_s8, 256 }
 0x99a   :  { %p2758_p11 = scmp.ne.s32.totalorder %s3195_s8, %s2757_s21  ;;  %p2761_p12 = scmp.lt.u32.totalorder %s2757_s21, %s3195_s8 }
 0x99c   :  { %p2763_p13 = pnand %p2761_p12, %p2758_p11 }
 0x99e   :  { %2766 = shalt.err (!%p2763_p13)
}
 0x99f   :  { %1786 = dma.vmem_to_hbm [thread:$0]  %s1781_s14, 256, %s3195_s8, [#allocation4], %s2782_s28, %s2782_s28, %s2783_s9  }
 0x9a0   :  { %2775 = dma.done.wait [#allocation4], 256  }
 0x9a1   :  { %2776 = vsyncadd [#allocation4], 4294967040 }
 0x9a2   :  { %1790 = vsyncpa [#allocation3], 1 }
 0x9a3   :  { %1791 = vsyncpa [#allocation6], 1 }
 0x9a4   :  { %1792 = vsyncpa [#allocation9], 1 }
 0x9a5   :  { %1793 = vsyncpa [#allocation12], 1 }
 0x9a6   :  { %1794 = vsyncpa [#allocation4], 1 }

</bundles_post_ra>
